<compile_context>
chip_gen: v7x
topology: tpu7x:2x2x1
jax: 0.10.0
libtpu: 0.0.40
codegen_flags: <defaults>
</compile_context>

<pallas_src>
import functools
import math

import numpy as np
import jax
import jax.numpy as jnp
from jax.experimental import pallas as pl
from jax.experimental.pallas import tpu as pltpu

# ----------------------------- small config ---------------------------------
BATCH = 2
SEQ = 8
HIDDEN = 64              # config.hidden_size
NUM_HEADS = 4            # config.num_attention_heads (== num_key_value_heads)
Q_LORA_RANK = 32         # config.q_lora_rank
KV_LORA_RANK = 32        # config.kv_lora_rank
QK_NOPE_DIM = 32         # config.qk_nope_head_dim
ROPE_DIM = 16            # config.qk_rope_head_dim
QK_HEAD_DIM = QK_NOPE_DIM + ROPE_DIM
V_HEAD_DIM = 32          # config.v_head_dim
ROPE_THETA = 10000.0
RMS_EPS = 1e-6
SCALING = QK_HEAD_DIM ** -0.5        # rope_scaling is None -> no yarn mscale
MASK_VALUE = float(np.finfo(np.float32).min)

NOPE_ALL = NUM_HEADS * QK_NOPE_DIM   # 128
ROPE_ALL = NUM_HEADS * ROPE_DIM      # 64
V_ALL = NUM_HEADS * V_HEAD_DIM       # 128

_PREC = jax.lax.Precision.HIGHEST    # reference only


# ----------------------------- kernel helpers --------------------------------
def _dot(a, b):
    """MXU matmul: bf16 operands, f32 accumulation."""
    return jnp.dot(a.astype(jnp.bfloat16), b.astype(jnp.bfloat16),
                   preferred_element_type=jnp.float32)


def _dot_nt(a, b):
    """a @ b.T (contract last dims): bf16 operands, f32 accumulation."""
    return jax.lax.dot_general(a.astype(jnp.bfloat16), b.astype(jnp.bfloat16),
                               (((1,), (1,)), ((), ())),
                               preferred_element_type=jnp.float32)


def _rms_norm(x, gamma):             # f32 throughout; gamma is (1, D)
    var = jnp.mean(x * x, axis=-1, keepdims=True)
    return x * jax.lax.rsqrt(var + RMS_EPS) * gamma


# ----------------------------- the fused kernel ------------------------------
def _make_mla_kernel(output_attentions):
    def kernel(x_ref, cos_ref, sin_ref, mask_ref, wa_ref, qa_g_ref, kva_g_ref,
               wqb_ref, wkvb_ref, wo_ref, *out_refs):
        out_ref = out_refs[0]
        x = x_ref[...]                                       # (T, H)  f32
        cos_q = cos_ref[...]                                 # (T, nH*Dr)
        sin_q = sin_ref[...]                                 # sign folded in

        # fused low-rank projections:
        #   [q_a | kv_a(kv) | kv_a(rope) | kv_a(rope, half-rolled)]
        a_all = _dot(x, wa_ref[...])                         # (T, Lq+Lkv+2*Dr)
        qa = _rms_norm(a_all[:, :Q_LORA_RANK], qa_g_ref[...])
        kc = _rms_norm(a_all[:, Q_LORA_RANK:Q_LORA_RANK + KV_LORA_RANK],
                       kva_g_ref[...])
        o0 = Q_LORA_RANK + KV_LORA_RANK
        k_rot = a_all[:, o0:o0 + ROPE_DIM]                   # (T, Dr)
        k_roll = a_all[:, o0 + ROPE_DIM:o0 + 2 * ROPE_DIM]   # half-rolled copy

        # RoPE on the shared (MQA) rope-key; interleave + rotate_half were
        # folded into the weight columns, sign into the sin table.
        cos_k = cos_q[:, :ROPE_DIM]
        sin_k = sin_q[:, :ROPE_DIM]
        k_rot = k_rot * cos_k + k_roll * sin_k               # (T, Dr)

        # head-batched q_b projection: [nope_all | rope_all | rope_rolled_all]
        q_all = _dot(qa, wqb_ref[...])                       # (T, 256)
        q_nope_all = q_all[:, :NOPE_ALL]
        q_rope_all = (q_all[:, NOPE_ALL:NOPE_ALL + ROPE_ALL] * cos_q
                      + q_all[:, NOPE_ALL + ROPE_ALL:] * sin_q)

        # head-batched kv_b projection: [k_nope_all | v_all]
        kv_all = _dot(kc, wkvb_ref[...])                     # (T, 256)
        k_nope_all = kv_all[:, :NOPE_ALL]
        v_all = kv_all[:, NOPE_ALL:]

        mask_bias = mask_ref[...]                            # block-diag causal

        attn_heads = []
        prob_heads = []
        for h in range(NUM_HEADS):                           # unrolled (small)
            qn = q_nope_all[:, h * QK_NOPE_DIM:(h + 1) * QK_NOPE_DIM]
            qr = q_rope_all[:, h * ROPE_DIM:(h + 1) * ROPE_DIM]
            kn = k_nope_all[:, h * QK_NOPE_DIM:(h + 1) * QK_NOPE_DIM]
            vh = v_all[:, h * V_HEAD_DIM:(h + 1) * V_HEAD_DIM]

            # q.k split into nope + rope partial dots (no concatenation)
            scores = (_dot_nt(qn, kn) + _dot_nt(qr, k_rot)) * SCALING + mask_bias
            m = jnp.max(scores, axis=-1, keepdims=True)
            e = jnp.exp(scores - m)
            probs = e * pl.reciprocal(jnp.sum(e, axis=-1, keepdims=True),
                                      approx=True)
            prob_heads.append(probs)
            attn_heads.append(_dot(probs, vh))               # (T, Dv)

        # single o_proj matmul over concatenated heads (K = nH*Dv = 128)
        out_ref[...] = _dot(jnp.concatenate(attn_heads, axis=-1), wo_ref[...])

        if output_attentions:
            out_refs[1][...] = jnp.concatenate(prob_heads, axis=-1)  # (T, nH*T)

    return kernel


# ----------------------------- wrapper ---------------------------------------
def mla_attention_forward(x, cos_q, sin_q, kp, output_attentions=True):
    batch, seq, hidden = x.shape
    tokens = batch * seq
    x2d = x.reshape(tokens, hidden)

    # block-diagonal causal mask over the folded (batch*seq) token axis
    tok = np.arange(tokens)
    same_batch = (tok[:, None] // seq) == (tok[None, :] // seq)
    causal = tok[None, :] <= tok[:, None]
    mask = jnp.asarray(
        np.where(same_batch & causal, 0.0, MASK_VALUE).astype(np.float32))

    def full_spec(shape):
        return pl.BlockSpec(shape, lambda i, nd=len(shape): (0,) * nd)

    inputs = [x2d, cos_q, sin_q, mask, kp["wa_all"], kp["qa_gamma"],
              kp["kva_gamma"], kp["wqb_all"], kp["wkvb_all"], kp["wo_t"]]
    in_specs = [full_spec(a.shape) for a in inputs]

    out_shape = [jax.ShapeDtypeStruct((tokens, hidden), jnp.float32)]
    out_specs = [full_spec((tokens, hidden))]
    if output_attentions:
        out_shape.append(jax.ShapeDtypeStruct((tokens, NUM_HEADS * tokens),
                                              jnp.float32))
        out_specs.append(full_spec((tokens, NUM_HEADS * tokens)))

    outs = pl.pallas_call(
        _make_mla_kernel(output_attentions),
        out_shape=tuple(out_shape),
        grid=(1,),
        in_specs=in_specs,
        out_specs=tuple(out_specs),
        compiler_params=pltpu.CompilerParams(
            dimension_semantics=("arbitrary",)),
    )(*inputs)

    attn_out = outs[0].reshape(batch, seq, hidden)
    if not output_attentions:
        return attn_out, None
    w = outs[1].reshape(batch, seq, NUM_HEADS, batch, seq)
    w = w[jnp.arange(batch), :, :, jnp.arange(batch), :]      # (B, S, nH, S)
    return attn_out, jnp.transpose(w, (0, 2, 1, 3))            # (B, nH, S, S)


# ----------------------------- params ----------------------------------------
def init_torch_layout_params(key):
    """Random weights in PyTorch nn.Linear layout: (out_features, in_features)."""
    ks = jax.random.split(key, 5)

    def lin(k, out_f, in_f):
        return jax.random.normal(k, (out_f, in_f), jnp.float32) / math.sqrt(in_f)

    return dict(
        w_q_a=lin(ks[0], Q_LORA_RANK, HIDDEN),
        q_a_ln=jnp.ones((Q_LORA_RANK,), jnp.float32),
        w_q_b=lin(ks[1], NUM_HEADS * QK_HEAD_DIM, Q_LORA_RANK),
        w_kv_a=lin(ks[2], KV_LORA_RANK + ROPE_DIM, HIDDEN),
        kv_a_ln=jnp.ones((KV_LORA_RANK,), jnp.float32),
        w_kv_b=lin(ks[3], NUM_HEADS * (QK_NOPE_DIM + V_HEAD_DIM), KV_LORA_RANK),
        w_o=lin(ks[4], HIDDEN, NUM_HEADS * V_HEAD_DIM),
    )


def _interleave_perm(d):
    # apply_rotary_pos_emb_interleave reorders the last dim as
    # [x0, x2, ..., x_{d-2}, x1, x3, ..., x_{d-1}]
    return np.concatenate([np.arange(0, d, 2), np.arange(1, d, 2)])


def _half_roll_perm(d):
    # rotate_half's half-rotation: output column j sources column (j + d/2) % d
    return (np.arange(d) + d // 2) % d


def prepare_kernel_params(p):
    """Transpose / head-batch / permute PyTorch weights; pre-cast to bf16."""
    perm_il = _interleave_perm(ROPE_DIM)
    perm_roll = _half_roll_perm(ROPE_DIM)

    # fused a-projection: [q_a | kv_a(kv) | kv_a(rope) | kv_a(rope rolled)]
    wqa_t = p["w_q_a"].T                                     # (H, Lq)
    wkva_t = p["w_kv_a"].T                                   # (H, Lkv+Dr)
    wkva_kv = wkva_t[:, :KV_LORA_RANK]
    wkva_rope = wkva_t[:, KV_LORA_RANK:][:, perm_il]         # interleave folded
    wa_all = jnp.concatenate(
        [wqa_t, wkva_kv, wkva_rope, wkva_rope[:, perm_roll]], axis=1)

    # head-batched q_b: [nope_all | rope_all | rope_rolled_all]
    wqb = p["w_q_b"].T.reshape(Q_LORA_RANK, NUM_HEADS, QK_HEAD_DIM)
    wqb_nope = wqb[:, :, :QK_NOPE_DIM]
    wqb_rope = wqb[:, :, QK_NOPE_DIM:][:, :, perm_il]        # interleave folded
    wqb_all = jnp.concatenate(
        [wqb_nope.reshape(Q_LORA_RANK, NOPE_ALL),
         wqb_rope.reshape(Q_LORA_RANK, ROPE_ALL),
         wqb_rope[:, :, perm_roll].reshape(Q_LORA_RANK, ROPE_ALL)], axis=1)

    # head-batched kv_b: [k_nope_all | v_all]
    wkvb = p["w_kv_b"].T.reshape(KV_LORA_RANK, NUM_HEADS,
                                 QK_NOPE_DIM + V_HEAD_DIM)
    wkvb_all = jnp.concatenate(
        [wkvb[:, :, :QK_NOPE_DIM].reshape(KV_LORA_RANK, NOPE_ALL),
         wkvb[:, :, QK_NOPE_DIM:].reshape(KV_LORA_RANK, V_ALL)], axis=1)

    return dict(
        wa_all=wa_all.astype(jnp.bfloat16),                  # (H, Lq+Lkv+2*Dr)
        wqb_all=wqb_all.astype(jnp.bfloat16),                # (Lq, 256)
        wkvb_all=wkvb_all.astype(jnp.bfloat16),              # (Lkv, 256)
        wo_t=p["w_o"].T.astype(jnp.bfloat16),                # (nH*Dv, H)
        qa_gamma=p["q_a_ln"].reshape(1, Q_LORA_RANK),        # f32 (norm math)
        kva_gamma=p["kv_a_ln"].reshape(1, KV_LORA_RANK),
    )


def rotary_tables(batch, seq):
    """cos/sin tables: lane-dense (B*S, nH*Dr) with rotate_half sign folded in,
    plus plain (B, S, Dr) tables for the pure-JAX reference."""
    inv_freq = 1.0 / (ROPE_THETA ** (np.arange(0, ROPE_DIM, 2,
                                                dtype=np.float32) / ROPE_DIM))
    pos = np.arange(seq, dtype=np.float32)
    freqs = np.outer(pos, inv_freq)                          # (S, Dr/2)
    emb = np.concatenate([freqs, freqs], axis=-1)            # (S, Dr)
    cos, sin = np.cos(emb), np.sin(emb)
    sign = np.concatenate([-np.ones(ROPE_DIM // 2, np.float32),
                           np.ones(ROPE_DIM // 2, np.float32)])
    cos_q = np.tile(np.tile(cos, (batch, 1)), (1, NUM_HEADS))       # (T, nH*Dr)
    sin_q = np.tile(np.tile(sin * sign, (batch, 1)), (1, NUM_HEADS))
    cos_ref = np.array(np.broadcast_to(cos, (batch, seq, ROPE_DIM)))
    sin_ref = np.array(np.broadcast_to(sin, (batch, seq, ROPE_DIM)))
    return (jnp.asarray(cos_q, jnp.float32), jnp.asarray(sin_q, jnp.float32),
            jnp.asarray(cos_ref), jnp.asarray(sin_ref))


# ----------------------------- pure-JAX reference ----------------------------
def _rotate_half_ref(x):
    half = x.shape[-1] // 2
    return jnp.concatenate([-x[..., half:], x[..., :half]], axis=-1)


def _apply_rope_interleave_ref(q, k, cos, sin):
    cos = cos[:, None, :, :]
    sin = sin[:, None, :, :]
    b, h, s, d = q.shape
    q = q.reshape(b, h, s, d // 2, 2).swapaxes(-1, -2).reshape(b, h, s, d)
    b, h, s, d = k.shape
    k = k.reshape(b, h, s, d // 2, 2).swapaxes(-1, -2).reshape(b, h, s, d)
    return q * cos + _rotate_half_ref(q) * sin, k * cos + _rotate_half_ref(k) * sin


def _rms_norm_ref(x, gamma):
    var = jnp.mean(x * x, axis=-1, keepdims=True)
    return gamma * (x * jax.lax.rsqrt(var + RMS_EPS))


def reference_forward(x, cos, sin, p):
    """Line-by-line port of DeepseekV3Attention.forward (eager, causal, f32)."""
    b, s, _ = x.shape
    mm = functools.partial(jnp.matmul, precision=_PREC)

    q = mm(_rms_norm_ref(mm(x, p["w_q_a"].T), p["q_a_ln"]), p["w_q_b"].T)
    q = q.reshape(b, s, NUM_HEADS, QK_HEAD_DIM).transpose(0, 2, 1, 3)
    q_pass, q_rot = q[..., :QK_NOPE_DIM], q[..., QK_NOPE_DIM:]

    ckv = mm(x, p["w_kv_a"].T)
    k_pass_c, k_rot = ckv[..., :KV_LORA_RANK], ckv[..., KV_LORA_RANK:]
    kv = mm(_rms_norm_ref(k_pass_c, p["kv_a_ln"]), p["w_kv_b"].T)
    kv = kv.reshape(b, s, NUM_HEADS, QK_NOPE_DIM + V_HEAD_DIM).transpose(0, 2, 1, 3)
    k_pass, value = kv[..., :QK_NOPE_DIM], kv[..., QK_NOPE_DIM:]
    k_rot = k_rot.reshape(b, 1, s, ROPE_DIM)

    q_rot, k_rot = _apply_rope_interleave_ref(q_rot, k_rot, cos, sin)
    k_rot = jnp.broadcast_to(k_rot, (b, NUM_HEADS, s, ROPE_DIM))
    query = jnp.concatenate([q_pass, q_rot], axis=-1)
    key = jnp.concatenate([k_pass, k_rot], axis=-1)

    scores = jnp.einsum("bhqd,bhkd->bhqk", query, key, precision=_PREC) * SCALING
    row = np.arange(s)[:, None]
    col = np.arange(s)[None, :]
    mask = jnp.asarray(np.where(col <= row, 0.0, MASK_VALUE).astype(np.float32))
    scores = scores + mask[None, None]
    probs = jax.nn.softmax(scores, axis=-1)
    attn = jnp.einsum("bhqk,bhkd->bhqd", probs, value, precision=_PREC)
    attn = attn.transpose(0, 2, 1, 3).reshape(b, s, NUM_HEADS * V_HEAD_DIM)
    return mm(attn, p["w_o"].T), probs


# ----------------------------- main -------------------------------------------
if __name__ == "__main__":
    key = jax.random.PRNGKey(0)
    k_x, k_p = jax.random.split(key)
    hidden_states = jax.random.normal(k_x, (BATCH, SEQ, HIDDEN), jnp.float32)

    torch_params = init_torch_layout_params(k_p)
    kernel_params = prepare_kernel_params(torch_params)
    cos_q, sin_q, cos_ref, sin_ref = rotary_tables(BATCH, SEQ)

    # full path (returns attention weights, like HF eager)
    fwd = jax.jit(functools.partial(mla_attention_forward,
                                    output_attentions=True))
    attn_out, attn_weights = fwd(hidden_states, cos_q, sin_q, kernel_params)
    attn_out = jax.block_until_ready(attn_out)

    # fast path (no attention-weights writeback)
    fwd_fast = jax.jit(functools.partial(mla_attention_forward,
                                         output_attentions=False))
    attn_out_fast, _ = fwd_fast(hidden_states, cos_q, sin_q, kernel_params)
    attn_out_fast = jax.block_until_ready(attn_out_fast)

    assert attn_out.shape == (BATCH, SEQ, HIDDEN)
    assert attn_weights.shape == (BATCH, NUM_HEADS, SEQ, SEQ)
    assert bool(jnp.all(jnp.isfinite(attn_out)))
    assert bool(jnp.all(jnp.isfinite(attn_weights)))

    ref_out, ref_w = reference_forward(hidden_states, cos_ref, sin_ref,
                                       torch_params)
    err_o = float(jnp.max(jnp.abs(attn_out - ref_out)))
    err_w = float(jnp.max(jnp.abs(attn_weights - ref_w)))
    err_f = float(jnp.max(jnp.abs(attn_out_fast - ref_out)))
    # bf16 matmul operands (f32 accumulation) + approx reciprocal vs an
    # all-f32 HIGHEST reference -> looser tolerance than the 5e-3 baseline.
    assert err_o < 8e-2 and err_f < 8e-2 and err_w < 3e-2, (err_o, err_f, err_w)

    print("KERNEL_OK")
</pallas_src>

<mosaic_0001>
module attributes {stable_mosaic.version = 11 : i64} {
  func.func @kernel(%arg0: i32, %arg1: memref<16x64xf32, #tpu.memory_space<vmem>>, %arg2: memref<16x64xf32, #tpu.memory_space<vmem>>, %arg3: memref<16x64xf32, #tpu.memory_space<vmem>>, %arg4: memref<16x16xf32, #tpu.memory_space<vmem>>, %arg5: memref<64x96xbf16, #tpu.memory_space<vmem>>, %arg6: memref<1x32xf32, #tpu.memory_space<vmem>>, %arg7: memref<1x32xf32, #tpu.memory_space<vmem>>, %arg8: memref<32x256xbf16, #tpu.memory_space<vmem>>, %arg9: memref<32x256xbf16, #tpu.memory_space<vmem>>, %arg10: memref<128x64xbf16, #tpu.memory_space<vmem>>, %arg11: memref<16x64xf32, #tpu.memory_space<vmem>>, %arg12: memref<16x64xf32, #tpu.memory_space<vmem>>) attributes {dimension_semantics = [#tpu.dimension_semantics<arbitrary>], iteration_bounds = array<i64: 1>, scalar_prefetch = 0 : i64, scratch_operands = 0 : i64, tpu.core_type = #tpu.core_type<tc>, window_params = [{pipeline_mode = #tpu.pipeline_mode<synchronous>, transform_indices = @transform_0, window_bounds = array<i64: 16, 64>}, {pipeline_mode = #tpu.pipeline_mode<synchronous>, transform_indices = @transform_1, window_bounds = array<i64: 16, 64>}, {pipeline_mode = #tpu.pipeline_mode<synchronous>, transform_indices = @transform_2, window_bounds = array<i64: 16, 64>}, {pipeline_mode = #tpu.pipeline_mode<synchronous>, transform_indices = @transform_3, window_bounds = array<i64: 16, 16>}, {pipeline_mode = #tpu.pipeline_mode<synchronous>, transform_indices = @transform_4, window_bounds = array<i64: 64, 96>}, {pipeline_mode = #tpu.pipeline_mode<synchronous>, transform_indices = @transform_5, window_bounds = array<i64: 1, 32>}, {pipeline_mode = #tpu.pipeline_mode<synchronous>, transform_indices = @transform_6, window_bounds = array<i64: 1, 32>}, {pipeline_mode = #tpu.pipeline_mode<synchronous>, transform_indices = @transform_7, window_bounds = array<i64: 32, 256>}, {pipeline_mode = #tpu.pipeline_mode<synchronous>, transform_indices = @transform_8, window_bounds = array<i64: 32, 256>}, {pipeline_mode = #tpu.pipeline_mode<synchronous>, transform_indices = @transform_9, window_bounds = array<i64: 128, 64>}, {pipeline_mode = #tpu.pipeline_mode<synchronous>, transform_indices = @transform_10, window_bounds = array<i64: 16, 64>}, {pipeline_mode = #tpu.pipeline_mode<synchronous>, transform_indices = @transform_11, window_bounds = array<i64: 16, 64>}]} {
    %c0 = arith.constant 0 : index
    %c0_0 = arith.constant 0 : index
    %0 = vector.load %arg1[%c0, %c0_0] : memref<16x64xf32, #tpu.memory_space<vmem>>, vector<16x64xf32>
    %c0_1 = arith.constant 0 : index
    %c0_2 = arith.constant 0 : index
    %1 = vector.load %arg2[%c0_1, %c0_2] : memref<16x64xf32, #tpu.memory_space<vmem>>, vector<16x64xf32>
    %c0_3 = arith.constant 0 : index
    %c0_4 = arith.constant 0 : index
    %2 = vector.load %arg3[%c0_3, %c0_4] : memref<16x64xf32, #tpu.memory_space<vmem>>, vector<16x64xf32>
    %c0_5 = arith.constant 0 : index
    %c0_6 = arith.constant 0 : index
    %3 = vector.load %arg5[%c0_5, %c0_6] : memref<64x96xbf16, #tpu.memory_space<vmem>>, vector<64x96xbf16>
    %4 = arith.truncf %0 : vector<16x64xf32> to vector<16x64xbf16>
    %cst = arith.constant dense<0.000000e+00> : vector<16x96xf32>
    %5 = tpu.matmul %4, %3, %cst {dimension_numbers = #tpu.dot_dimension_numbers<[1], [0], [0], [1], [0, 0, 1, 1], [], []>} : vector<16x64xbf16>, vector<64x96xbf16>, vector<16x96xf32> -> vector<16x96xf32>
    %6 = vector.extract_strided_slice %5 {offsets = [0, 0], sizes = [16, 32], strides = [1, 1]} : vector<16x96xf32> to vector<16x32xf32>
    %c0_7 = arith.constant 0 : index
    %c0_8 = arith.constant 0 : index
    %7 = vector.load %arg6[%c0_7, %c0_8] : memref<1x32xf32, #tpu.memory_space<vmem>>, vector<1x32xf32>
    %8 = arith.mulf %6, %6 : vector<16x32xf32>
    %cst_9 = arith.constant dense<0.000000e+00> : vector<16xf32>
    %9 = vector.multi_reduction <add>, %8, %cst_9 [1] : vector<16x32xf32> to vector<16xf32>
    %10 = vector.shape_cast %9 : vector<16xf32> to vector<16x1xf32>
    %cst_10 = arith.constant 3.200000e+01 : f32
    %11 = vector.broadcast %cst_10 : f32 to vector<16x1xf32>
    %12 = arith.divf %10, %11 : vector<16x1xf32>
    %cst_11 = arith.constant 9.99999997E-7 : f32
    %13 = vector.broadcast %cst_11 : f32 to vector<16x1xf32>
    %14 = arith.addf %12, %13 : vector<16x1xf32>
    %15 = math.rsqrt %14 : vector<16x1xf32>
    %16 = vector.broadcast %15 : vector<16x1xf32> to vector<16x32xf32>
    %17 = arith.mulf %6, %16 : vector<16x32xf32>
    %18 = vector.broadcast %7 : vector<1x32xf32> to vector<16x32xf32>
    %19 = arith.mulf %17, %18 : vector<16x32xf32>
    %20 = vector.extract_strided_slice %5 {offsets = [0, 32], sizes = [16, 32], strides = [1, 1]} : vector<16x96xf32> to vector<16x32xf32>
    %c0_12 = arith.constant 0 : index
    %c0_13 = arith.constant 0 : index
    %21 = vector.load %arg7[%c0_12, %c0_13] : memref<1x32xf32, #tpu.memory_space<vmem>>, vector<1x32xf32>
    %22 = arith.mulf %20, %20 : vector<16x32xf32>
    %cst_14 = arith.constant dense<0.000000e+00> : vector<16xf32>
    %23 = vector.multi_reduction <add>, %22, %cst_14 [1] : vector<16x32xf32> to vector<16xf32>
    %24 = vector.shape_cast %23 : vector<16xf32> to vector<16x1xf32>
    %cst_15 = arith.constant 3.200000e+01 : f32
    %25 = vector.broadcast %cst_15 : f32 to vector<16x1xf32>
    %26 = arith.divf %24, %25 : vector<16x1xf32>
    %cst_16 = arith.constant 9.99999997E-7 : f32
    %27 = vector.broadcast %cst_16 : f32 to vector<16x1xf32>
    %28 = arith.addf %26, %27 : vector<16x1xf32>
    %29 = math.rsqrt %28 : vector<16x1xf32>
    %30 = vector.broadcast %29 : vector<16x1xf32> to vector<16x32xf32>
    %31 = arith.mulf %20, %30 : vector<16x32xf32>
    %32 = vector.broadcast %21 : vector<1x32xf32> to vector<16x32xf32>
    %33 = arith.mulf %31, %32 : vector<16x32xf32>
    %34 = vector.extract_strided_slice %5 {offsets = [0, 64], sizes = [16, 16], strides = [1, 1]} : vector<16x96xf32> to vector<16x16xf32>
    %35 = vector.extract_strided_slice %5 {offsets = [0, 80], sizes = [16, 16], strides = [1, 1]} : vector<16x96xf32> to vector<16x16xf32>
    %36 = vector.extract_strided_slice %1 {offsets = [0, 0], sizes = [16, 16], strides = [1, 1]} : vector<16x64xf32> to vector<16x16xf32>
    %37 = vector.extract_strided_slice %2 {offsets = [0, 0], sizes = [16, 16], strides = [1, 1]} : vector<16x64xf32> to vector<16x16xf32>
    %38 = arith.mulf %34, %36 : vector<16x16xf32>
    %39 = arith.mulf %35, %37 : vector<16x16xf32>
    %40 = arith.addf %38, %39 : vector<16x16xf32>
    %c0_17 = arith.constant 0 : index
    %c0_18 = arith.constant 0 : index
    %41 = vector.load %arg8[%c0_17, %c0_18] : memref<32x256xbf16, #tpu.memory_space<vmem>>, vector<32x256xbf16>
    %42 = arith.truncf %19 : vector<16x32xf32> to vector<16x32xbf16>
    %cst_19 = arith.constant dense<0.000000e+00> : vector<16x256xf32>
    %43 = tpu.matmul %42, %41, %cst_19 {dimension_numbers = #tpu.dot_dimension_numbers<[1], [0], [0], [1], [0, 0, 1, 1], [], []>} : vector<16x32xbf16>, vector<32x256xbf16>, vector<16x256xf32> -> vector<16x256xf32>
    %44 = vector.extract_strided_slice %43 {offsets = [0, 0], sizes = [16, 128], strides = [1, 1]} : vector<16x256xf32> to vector<16x128xf32>
    %45 = vector.extract_strided_slice %43 {offsets = [0, 128], sizes = [16, 64], strides = [1, 1]} : vector<16x256xf32> to vector<16x64xf32>
    %46 = arith.mulf %45, %1 : vector<16x64xf32>
    %47 = vector.extract_strided_slice %43 {offsets = [0, 192], sizes = [16, 64], strides = [1, 1]} : vector<16x256xf32> to vector<16x64xf32>
    %48 = arith.mulf %47, %2 : vector<16x64xf32>
    %49 = arith.addf %46, %48 : vector<16x64xf32>
    %c0_20 = arith.constant 0 : index
    %c0_21 = arith.constant 0 : index
    %50 = vector.load %arg9[%c0_20, %c0_21] : memref<32x256xbf16, #tpu.memory_space<vmem>>, vector<32x256xbf16>
    %51 = arith.truncf %33 : vector<16x32xf32> to vector<16x32xbf16>
    %cst_22 = arith.constant dense<0.000000e+00> : vector<16x256xf32>
    %52 = tpu.matmul %51, %50, %cst_22 {dimension_numbers = #tpu.dot_dimension_numbers<[1], [0], [0], [1], [0, 0, 1, 1], [], []>} : vector<16x32xbf16>, vector<32x256xbf16>, vector<16x256xf32> -> vector<16x256xf32>
    %53 = vector.extract_strided_slice %52 {offsets = [0, 0], sizes = [16, 128], strides = [1, 1]} : vector<16x256xf32> to vector<16x128xf32>
    %54 = vector.extract_strided_slice %52 {offsets = [0, 128], sizes = [16, 128], strides = [1, 1]} : vector<16x256xf32> to vector<16x128xf32>
    %c0_23 = arith.constant 0 : index
    %c0_24 = arith.constant 0 : index
    %55 = vector.load %arg4[%c0_23, %c0_24] : memref<16x16xf32, #tpu.memory_space<vmem>>, vector<16x16xf32>
    %56 = vector.extract_strided_slice %44 {offsets = [0, 0], sizes = [16, 32], strides = [1, 1]} : vector<16x128xf32> to vector<16x32xf32>
    %57 = vector.extract_strided_slice %49 {offsets = [0, 0], sizes = [16, 16], strides = [1, 1]} : vector<16x64xf32> to vector<16x16xf32>
    %58 = vector.extract_strided_slice %53 {offsets = [0, 0], sizes = [16, 32], strides = [1, 1]} : vector<16x128xf32> to vector<16x32xf32>
    %59 = vector.extract_strided_slice %54 {offsets = [0, 0], sizes = [16, 32], strides = [1, 1]} : vector<16x128xf32> to vector<16x32xf32>
    %60 = arith.truncf %56 : vector<16x32xf32> to vector<16x32xbf16>
    %61 = arith.truncf %58 : vector<16x32xf32> to vector<16x32xbf16>
    %cst_25 = arith.constant dense<0.000000e+00> : vector<16x16xf32>
    %62 = tpu.matmul %60, %61, %cst_25 {dimension_numbers = #tpu.dot_dimension_numbers<[1], [1], [0], [0], [0, 0, 1, 0], [], []>} : vector<16x32xbf16>, vector<16x32xbf16>, vector<16x16xf32> -> vector<16x16xf32>
    %63 = arith.truncf %57 : vector<16x16xf32> to vector<16x16xbf16>
    %64 = arith.truncf %40 : vector<16x16xf32> to vector<16x16xbf16>
    %cst_26 = arith.constant dense<0.000000e+00> : vector<16x16xf32>
    %65 = tpu.matmul %63, %64, %cst_26 {dimension_numbers = #tpu.dot_dimension_numbers<[1], [1], [0], [0], [0, 0, 1, 0], [], []>} : vector<16x16xbf16>, vector<16x16xbf16>, vector<16x16xf32> -> vector<16x16xf32>
    %66 = arith.addf %62, %65 : vector<16x16xf32>
    %cst_27 = arith.constant 0.144337565 : f32
    %67 = vector.broadcast %cst_27 : f32 to vector<16x16xf32>
    %68 = arith.mulf %66, %67 : vector<16x16xf32>
    %69 = arith.addf %68, %55 : vector<16x16xf32>
    %cst_28 = arith.constant dense<0xFF800000> : vector<16xf32>
    %70 = vector.multi_reduction <maximumf>, %69, %cst_28 [1] : vector<16x16xf32> to vector<16xf32>
    %71 = vector.shape_cast %70 : vector<16xf32> to vector<16x1xf32>
    %72 = vector.broadcast %71 : vector<16x1xf32> to vector<16x16xf32>
    %73 = arith.subf %69, %72 : vector<16x16xf32>
    %74 = math.exp %73 : vector<16x16xf32>
    %cst_29 = arith.constant dense<0.000000e+00> : vector<16xf32>
    %75 = vector.multi_reduction <add>, %74, %cst_29 [1] : vector<16x16xf32> to vector<16xf32>
    %76 = vector.shape_cast %75 : vector<16xf32> to vector<16x1xf32>
    %77 = tpu.reciprocal %76 {approx = true} : vector<16x1xf32> -> vector<16x1xf32>
    %78 = vector.broadcast %77 : vector<16x1xf32> to vector<16x16xf32>
    %79 = arith.mulf %74, %78 : vector<16x16xf32>
    %80 = arith.truncf %79 : vector<16x16xf32> to vector<16x16xbf16>
    %81 = arith.truncf %59 : vector<16x32xf32> to vector<16x32xbf16>
    %cst_30 = arith.constant dense<0.000000e+00> : vector<16x32xf32>
    %82 = tpu.matmul %80, %81, %cst_30 {dimension_numbers = #tpu.dot_dimension_numbers<[1], [0], [0], [1], [0, 0, 1, 1], [], []>} : vector<16x16xbf16>, vector<16x32xbf16>, vector<16x32xf32> -> vector<16x32xf32>
    %83 = vector.extract_strided_slice %44 {offsets = [0, 32], sizes = [16, 32], strides = [1, 1]} : vector<16x128xf32> to vector<16x32xf32>
    %84 = vector.extract_strided_slice %49 {offsets = [0, 16], sizes = [16, 16], strides = [1, 1]} : vector<16x64xf32> to vector<16x16xf32>
    %85 = vector.extract_strided_slice %53 {offsets = [0, 32], sizes = [16, 32], strides = [1, 1]} : vector<16x128xf32> to vector<16x32xf32>
    %86 = vector.extract_strided_slice %54 {offsets = [0, 32], sizes = [16, 32], strides = [1, 1]} : vector<16x128xf32> to vector<16x32xf32>
    %87 = arith.truncf %83 : vector<16x32xf32> to vector<16x32xbf16>
    %88 = arith.truncf %85 : vector<16x32xf32> to vector<16x32xbf16>
    %cst_31 = arith.constant dense<0.000000e+00> : vector<16x16xf32>
    %89 = tpu.matmul %87, %88, %cst_31 {dimension_numbers = #tpu.dot_dimension_numbers<[1], [1], [0], [0], [0, 0, 1, 0], [], []>} : vector<16x32xbf16>, vector<16x32xbf16>, vector<16x16xf32> -> vector<16x16xf32>
    %90 = arith.truncf %84 : vector<16x16xf32> to vector<16x16xbf16>
    %91 = arith.truncf %40 : vector<16x16xf32> to vector<16x16xbf16>
    %cst_32 = arith.constant dense<0.000000e+00> : vector<16x16xf32>
    %92 = tpu.matmul %90, %91, %cst_32 {dimension_numbers = #tpu.dot_dimension_numbers<[1], [1], [0], [0], [0, 0, 1, 0], [], []>} : vector<16x16xbf16>, vector<16x16xbf16>, vector<16x16xf32> -> vector<16x16xf32>
    %93 = arith.addf %89, %92 : vector<16x16xf32>
    %cst_33 = arith.constant 0.144337565 : f32
    %94 = vector.broadcast %cst_33 : f32 to vector<16x16xf32>
    %95 = arith.mulf %93, %94 : vector<16x16xf32>
    %96 = arith.addf %95, %55 : vector<16x16xf32>
    %cst_34 = arith.constant dense<0xFF800000> : vector<16xf32>
    %97 = vector.multi_reduction <maximumf>, %96, %cst_34 [1] : vector<16x16xf32> to vector<16xf32>
    %98 = vector.shape_cast %97 : vector<16xf32> to vector<16x1xf32>
    %99 = vector.broadcast %98 : vector<16x1xf32> to vector<16x16xf32>
    %100 = arith.subf %96, %99 : vector<16x16xf32>
    %101 = math.exp %100 : vector<16x16xf32>
    %cst_35 = arith.constant dense<0.000000e+00> : vector<16xf32>
    %102 = vector.multi_reduction <add>, %101, %cst_35 [1] : vector<16x16xf32> to vector<16xf32>
    %103 = vector.shape_cast %102 : vector<16xf32> to vector<16x1xf32>
    %104 = tpu.reciprocal %103 {approx = true} : vector<16x1xf32> -> vector<16x1xf32>
    %105 = vector.broadcast %104 : vector<16x1xf32> to vector<16x16xf32>
    %106 = arith.mulf %101, %105 : vector<16x16xf32>
    %107 = arith.truncf %106 : vector<16x16xf32> to vector<16x16xbf16>
    %108 = arith.truncf %86 : vector<16x32xf32> to vector<16x32xbf16>
    %cst_36 = arith.constant dense<0.000000e+00> : vector<16x32xf32>
    %109 = tpu.matmul %107, %108, %cst_36 {dimension_numbers = #tpu.dot_dimension_numbers<[1], [0], [0], [1], [0, 0, 1, 1], [], []>} : vector<16x16xbf16>, vector<16x32xbf16>, vector<16x32xf32> -> vector<16x32xf32>
    %110 = vector.extract_strided_slice %44 {offsets = [0, 64], sizes = [16, 32], strides = [1, 1]} : vector<16x128xf32> to vector<16x32xf32>
    %111 = vector.extract_strided_slice %49 {offsets = [0, 32], sizes = [16, 16], strides = [1, 1]} : vector<16x64xf32> to vector<16x16xf32>
    %112 = vector.extract_strided_slice %53 {offsets = [0, 64], sizes = [16, 32], strides = [1, 1]} : vector<16x128xf32> to vector<16x32xf32>
    %113 = vector.extract_strided_slice %54 {offsets = [0, 64], sizes = [16, 32], strides = [1, 1]} : vector<16x128xf32> to vector<16x32xf32>
    %114 = arith.truncf %110 : vector<16x32xf32> to vector<16x32xbf16>
    %115 = arith.truncf %112 : vector<16x32xf32> to vector<16x32xbf16>
    %cst_37 = arith.constant dense<0.000000e+00> : vector<16x16xf32>
    %116 = tpu.matmul %114, %115, %cst_37 {dimension_numbers = #tpu.dot_dimension_numbers<[1], [1], [0], [0], [0, 0, 1, 0], [], []>} : vector<16x32xbf16>, vector<16x32xbf16>, vector<16x16xf32> -> vector<16x16xf32>
    %117 = arith.truncf %111 : vector<16x16xf32> to vector<16x16xbf16>
    %118 = arith.truncf %40 : vector<16x16xf32> to vector<16x16xbf16>
    %cst_38 = arith.constant dense<0.000000e+00> : vector<16x16xf32>
    %119 = tpu.matmul %117, %118, %cst_38 {dimension_numbers = #tpu.dot_dimension_numbers<[1], [1], [0], [0], [0, 0, 1, 0], [], []>} : vector<16x16xbf16>, vector<16x16xbf16>, vector<16x16xf32> -> vector<16x16xf32>
    %120 = arith.addf %116, %119 : vector<16x16xf32>
    %cst_39 = arith.constant 0.144337565 : f32
    %121 = vector.broadcast %cst_39 : f32 to vector<16x16xf32>
    %122 = arith.mulf %120, %121 : vector<16x16xf32>
    %123 = arith.addf %122, %55 : vector<16x16xf32>
    %cst_40 = arith.constant dense<0xFF800000> : vector<16xf32>
    %124 = vector.multi_reduction <maximumf>, %123, %cst_40 [1] : vector<16x16xf32> to vector<16xf32>
    %125 = vector.shape_cast %124 : vector<16xf32> to vector<16x1xf32>
    %126 = vector.broadcast %125 : vector<16x1xf32> to vector<16x16xf32>
    %127 = arith.subf %123, %126 : vector<16x16xf32>
    %128 = math.exp %127 : vector<16x16xf32>
    %cst_41 = arith.constant dense<0.000000e+00> : vector<16xf32>
    %129 = vector.multi_reduction <add>, %128, %cst_41 [1] : vector<16x16xf32> to vector<16xf32>
    %130 = vector.shape_cast %129 : vector<16xf32> to vector<16x1xf32>
    %131 = tpu.reciprocal %130 {approx = true} : vector<16x1xf32> -> vector<16x1xf32>
    %132 = vector.broadcast %131 : vector<16x1xf32> to vector<16x16xf32>
    %133 = arith.mulf %128, %132 : vector<16x16xf32>
    %134 = arith.truncf %133 : vector<16x16xf32> to vector<16x16xbf16>
    %135 = arith.truncf %113 : vector<16x32xf32> to vector<16x32xbf16>
    %cst_42 = arith.constant dense<0.000000e+00> : vector<16x32xf32>
    %136 = tpu.matmul %134, %135, %cst_42 {dimension_numbers = #tpu.dot_dimension_numbers<[1], [0], [0], [1], [0, 0, 1, 1], [], []>} : vector<16x16xbf16>, vector<16x32xbf16>, vector<16x32xf32> -> vector<16x32xf32>
    %137 = vector.extract_strided_slice %44 {offsets = [0, 96], sizes = [16, 32], strides = [1, 1]} : vector<16x128xf32> to vector<16x32xf32>
    %138 = vector.extract_strided_slice %49 {offsets = [0, 48], sizes = [16, 16], strides = [1, 1]} : vector<16x64xf32> to vector<16x16xf32>
    %139 = vector.extract_strided_slice %53 {offsets = [0, 96], sizes = [16, 32], strides = [1, 1]} : vector<16x128xf32> to vector<16x32xf32>
    %140 = vector.extract_strided_slice %54 {offsets = [0, 96], sizes = [16, 32], strides = [1, 1]} : vector<16x128xf32> to vector<16x32xf32>
    %141 = arith.truncf %137 : vector<16x32xf32> to vector<16x32xbf16>
    %142 = arith.truncf %139 : vector<16x32xf32> to vector<16x32xbf16>
    %cst_43 = arith.constant dense<0.000000e+00> : vector<16x16xf32>
    %143 = tpu.matmul %141, %142, %cst_43 {dimension_numbers = #tpu.dot_dimension_numbers<[1], [1], [0], [0], [0, 0, 1, 0], [], []>} : vector<16x32xbf16>, vector<16x32xbf16>, vector<16x16xf32> -> vector<16x16xf32>
    %144 = arith.truncf %138 : vector<16x16xf32> to vector<16x16xbf16>
    %145 = arith.truncf %40 : vector<16x16xf32> to vector<16x16xbf16>
    %cst_44 = arith.constant dense<0.000000e+00> : vector<16x16xf32>
    %146 = tpu.matmul %144, %145, %cst_44 {dimension_numbers = #tpu.dot_dimension_numbers<[1], [1], [0], [0], [0, 0, 1, 0], [], []>} : vector<16x16xbf16>, vector<16x16xbf16>, vector<16x16xf32> -> vector<16x16xf32>
    %147 = arith.addf %143, %146 : vector<16x16xf32>
    %cst_45 = arith.constant 0.144337565 : f32
    %148 = vector.broadcast %cst_45 : f32 to vector<16x16xf32>
    %149 = arith.mulf %147, %148 : vector<16x16xf32>
    %150 = arith.addf %149, %55 : vector<16x16xf32>
    %cst_46 = arith.constant dense<0xFF800000> : vector<16xf32>
    %151 = vector.multi_reduction <maximumf>, %150, %cst_46 [1] : vector<16x16xf32> to vector<16xf32>
    %152 = vector.shape_cast %151 : vector<16xf32> to vector<16x1xf32>
    %153 = vector.broadcast %152 : vector<16x1xf32> to vector<16x16xf32>
    %154 = arith.subf %150, %153 : vector<16x16xf32>
    %155 = math.exp %154 : vector<16x16xf32>
    %cst_47 = arith.constant dense<0.000000e+00> : vector<16xf32>
    %156 = vector.multi_reduction <add>, %155, %cst_47 [1] : vector<16x16xf32> to vector<16xf32>
    %157 = vector.shape_cast %156 : vector<16xf32> to vector<16x1xf32>
    %158 = tpu.reciprocal %157 {approx = true} : vector<16x1xf32> -> vector<16x1xf32>
    %159 = vector.broadcast %158 : vector<16x1xf32> to vector<16x16xf32>
    %160 = arith.mulf %155, %159 : vector<16x16xf32>
    %161 = arith.truncf %160 : vector<16x16xf32> to vector<16x16xbf16>
    %162 = arith.truncf %140 : vector<16x32xf32> to vector<16x32xbf16>
    %cst_48 = arith.constant dense<0.000000e+00> : vector<16x32xf32>
    %163 = tpu.matmul %161, %162, %cst_48 {dimension_numbers = #tpu.dot_dimension_numbers<[1], [0], [0], [1], [0, 0, 1, 1], [], []>} : vector<16x16xbf16>, vector<16x32xbf16>, vector<16x32xf32> -> vector<16x32xf32>
    %164 = tpu.concatenate %82, %109, %136, %163 in 1 : vector<16x32xf32>, vector<16x32xf32>, vector<16x32xf32>, vector<16x32xf32> -> vector<16x128xf32>
    %c0_49 = arith.constant 0 : index
    %c0_50 = arith.constant 0 : index
    %165 = vector.load %arg10[%c0_49, %c0_50] : memref<128x64xbf16, #tpu.memory_space<vmem>>, vector<128x64xbf16>
    %166 = arith.truncf %164 : vector<16x128xf32> to vector<16x128xbf16>
    %cst_51 = arith.constant dense<0.000000e+00> : vector<16x64xf32>
    %167 = tpu.matmul %166, %165, %cst_51 {dimension_numbers = #tpu.dot_dimension_numbers<[1], [0], [0], [1], [0, 0, 1, 1], [], []>} : vector<16x128xbf16>, vector<128x64xbf16>, vector<16x64xf32> -> vector<16x64xf32>
    %c0_52 = arith.constant 0 : index
    %c0_53 = arith.constant 0 : index
    %168 = vector.load %arg11[%c0_52, %c0_53] : memref<16x64xf32, #tpu.memory_space<vmem>>, vector<16x64xf32>
    tpu.vector_store %arg11[%c0_52, %c0_53], %167 {strides = array<i32>} : memref<16x64xf32, #tpu.memory_space<vmem>>, vector<16x64xf32>,
    %169 = tpu.concatenate %79, %106, %133, %160 in 1 : vector<16x16xf32>, vector<16x16xf32>, vector<16x16xf32>, vector<16x16xf32> -> vector<16x64xf32>
    %c0_54 = arith.constant 0 : index
    %c0_55 = arith.constant 0 : index
    %170 = vector.load %arg12[%c0_54, %c0_55] : memref<16x64xf32, #tpu.memory_space<vmem>>, vector<16x64xf32>
    tpu.vector_store %arg12[%c0_54, %c0_55], %169 {strides = array<i32>} : memref<16x64xf32, #tpu.memory_space<vmem>>, vector<16x64xf32>,
    return
  }
  func.func @transform_0(%arg0: i32) -> (i32, i32) {
    %c0_i32 = arith.constant 0 : i32
    %c0_i32_0 = arith.constant 0 : i32
    %c0_i32_1 = arith.constant 0 : i32
    return %c0_i32, %c0_i32_0 : i32, i32
  }
  func.func @transform_1(%arg0: i32) -> (i32, i32) {
    %c0_i32 = arith.constant 0 : i32
    %c0_i32_0 = arith.constant 0 : i32
    %c0_i32_1 = arith.constant 0 : i32
    return %c0_i32, %c0_i32_0 : i32, i32
  }
  func.func @transform_2(%arg0: i32) -> (i32, i32) {
    %c0_i32 = arith.constant 0 : i32
    %c0_i32_0 = arith.constant 0 : i32
    %c0_i32_1 = arith.constant 0 : i32
    return %c0_i32, %c0_i32_0 : i32, i32
  }
  func.func @transform_3(%arg0: i32) -> (i32, i32) {
    %c0_i32 = arith.constant 0 : i32
    %c0_i32_0 = arith.constant 0 : i32
    %c0_i32_1 = arith.constant 0 : i32
    return %c0_i32, %c0_i32_0 : i32, i32
  }
  func.func @transform_4(%arg0: i32) -> (i32, i32) {
    %c0_i32 = arith.constant 0 : i32
    %c0_i32_0 = arith.constant 0 : i32
    %c0_i32_1 = arith.constant 0 : i32
    return %c0_i32, %c0_i32_0 : i32, i32
  }
  func.func @transform_5(%arg0: i32) -> (i32, i32) {
    %c0_i32 = arith.constant 0 : i32
    %c0_i32_0 = arith.constant 0 : i32
    %c0_i32_1 = arith.constant 0 : i32
    return %c0_i32, %c0_i32_0 : i32, i32
  }
  func.func @transform_6(%arg0: i32) -> (i32, i32) {
    %c0_i32 = arith.constant 0 : i32
    %c0_i32_0 = arith.constant 0 : i32
    %c0_i32_1 = arith.constant 0 : i32
    return %c0_i32, %c0_i32_0 : i32, i32
  }
  func.func @transform_7(%arg0: i32) -> (i32, i32) {
    %c0_i32 = arith.constant 0 : i32
    %c0_i32_0 = arith.constant 0 : i32
    %c0_i32_1 = arith.constant 0 : i32
    return %c0_i32, %c0_i32_0 : i32, i32
  }
  func.func @transform_8(%arg0: i32) -> (i32, i32) {
    %c0_i32 = arith.constant 0 : i32
    %c0_i32_0 = arith.constant 0 : i32
    %c0_i32_1 = arith.constant 0 : i32
    return %c0_i32, %c0_i32_0 : i32, i32
  }
  func.func @transform_9(%arg0: i32) -> (i32, i32) {
    %c0_i32 = arith.constant 0 : i32
    %c0_i32_0 = arith.constant 0 : i32
    %c0_i32_1 = arith.constant 0 : i32
    return %c0_i32, %c0_i32_0 : i32, i32
  }
  func.func @transform_10(%arg0: i32) -> (i32, i32) {
    %c0_i32 = arith.constant 0 : i32
    %c0_i32_0 = arith.constant 0 : i32
    %c0_i32_1 = arith.constant 0 : i32
    return %c0_i32, %c0_i32_0 : i32, i32
  }
  func.func @transform_11(%arg0: i32) -> (i32, i32) {
    %c0_i32 = arith.constant 0 : i32
    %c0_i32_0 = arith.constant 0 : i32
    %c0_i32_1 = arith.constant 0 : i32
    return %c0_i32, %c0_i32_0 : i32, i32
  }
}

</mosaic_0001>

<bundles_post_ra>
// kernel: mla_attention_forward.1
= control target key start
LH: loop header
LB: loop body
LE: loop exit
PB: predicated region body
PF: predicated region fallthrough
CT: control target
= control target key end

     0   :  { %17 = vsyncpa [#allocation3], 0  ;;  %s2097_s0 = inlined_call_operand.vmem [shape: f32[16,64], index: 0, kind: input, shape index: {}]   ;;  %s2098_s1 = inlined_call_operand.hbm [shape: f32[16,64], index: 1, kind: input, shape index: {}]   ;;  %s2099_s2 = inlined_call_operand.hbm [shape: f32[16,64], index: 2, kind: input, shape index: {}]   ;;  %s2100_s3 = inlined_call_operand.vmem [shape: f32[16,16], index: 3, kind: input, shape index: {}]   ;;  %s2101_s4 = inlined_call_operand.vmem [shape: bf16[64,96], index: 4, kind: input, shape index: {}]   ;;  %s2102_s5 = inlined_call_operand.vmem [shape: f32[1,32], index: 5, kind: input, shape index: {}]   ;;  %s2103_s6 = inlined_call_operand.vmem [shape: f32[1,32], index: 6, kind: input, shape index: {}]   ;;  %s2104_s7 = inlined_call_operand.vmem [shape: bf16[32,256], index: 7, kind: input, shape index: {}]   ;;  %s2105_s8 = inlined_call_operand.vmem [shape: bf16[32,256], index: 8, kind: input, shape index: {}]   ;;  %s2106_s9 = inlined_call_operand.vmem [shape: bf16[128,64], index: 9, kind: input, shape index: {}]   ;;  %s2107_s10 = inlined_call_operand.hbm [shape: f32[16,64], index: 10, kind: output, shape index: {0}]   ;;  %s2108_s11 = inlined_call_operand.vmem [shape: f32[16,64], index: 11, kind: output, shape index: {1}]  }
   0x1   :  { %18 = vsyncpa [#allocation6], 0 }
   0x2   :  { %19 = vsyncpa [#allocation4], 0  ;;  %s1654_s17 = smov [#allocation2]   ;;  %s1582_s21 = scalar_lea.hbm %s2098_s1, 256 }
   0x3   :  { %s27_s18 = sshll.u32 %s1654_s17, 4  ;;  %p1583_p0 = scmp.ne.s32.totalorder %s2098_s1, %s1582_s21  ;;  %s28_s18 = int_to_ptr.vmem [resolvable:$true] %s27_s18 }
   0x4   :  { %p1586_p1 = scmp.lt.u32.totalorder %s1582_s21, %s2098_s1 }
   0x6   :  { %p1588_p2 = pnand %p1586_p1, %p1583_p0 }
   0x8   :  { %1591 = shalt.err (!%p1588_p2)
}
   0x9   :  { %s1592_s26 = scalar_lea.vmem %s28_s18, 256  ;;  %p1597_p4 = scmp.lt.s32.totalorder %s28_s18, %s28_s18 }
   0xa   :  { %p1593_p3 = scmp.ne.s32.totalorder %s28_s18, %s1592_s26  ;;  %p1598_p5 = scmp.lt.s32.totalorder %s1592_s26, %s1592_s26 }
   0xc   :  { %p1599_p6 = por %p1598_p5, %p1597_p4 }
   0xe   :  { %p1600_p7 = pnand %p1599_p6, %p1593_p3 }
  0x10   :  { %1603 = shalt.err (!%p1600_p7)
}
  0x11   :  { %s1655_s27 = smov 128   ;;  %s1656_s28 = smov 8  }
  0x12   :  { %33 = dma.hbm_to_vmem [thread:$0]  %s2098_s1, 256, %s28_s18, [#allocation3], %s1655_s27, %s1655_s27, %s1656_s28  }
  0x13   :  { %s1657_s12 = smov [#allocation5]   ;;  %s1604_s16 = scalar_lea.hbm %s2099_s2, 256 }
  0x14   :  { %s39_s13 = sshll.u32 %s1657_s12, 4  ;;  %p1605_p8 = scmp.ne.s32.totalorder %s2099_s2, %s1604_s16  ;;  %s40_s13 = int_to_ptr.vmem [resolvable:$true] %s39_s13 }
  0x15   :  { %p1608_p9 = scmp.lt.u32.totalorder %s1604_s16, %s2099_s2 }
  0x17   :  { %p1610_p10 = pnand %p1608_p9, %p1605_p8 }
  0x19   :  { %1613 = shalt.err (!%p1610_p10)
}
  0x1a   :  { %s1614_s22 = scalar_lea.vmem %s40_s13, 256  ;;  %p1619_p12 = scmp.lt.s32.totalorder %s40_s13, %s40_s13 }
  0x1b   :  { %p1615_p11 = scmp.ne.s32.totalorder %s40_s13, %s1614_s22  ;;  %p1620_p13 = scmp.lt.s32.totalorder %s1614_s22, %s1614_s22 }
  0x1d   :  { %p1621_p0 = por %p1620_p13, %p1619_p12 }
  0x1f   :  { %p1622_p1 = pnand %p1621_p0, %p1615_p11 }
  0x21   :  { %1625 = shalt.err (!%p1622_p1)
}
  0x22   :  { %45 = dma.hbm_to_vmem [thread:$0]  %s2099_s2, 256, %s40_s13, [#allocation6], %s1655_s27, %s1655_s27, %s1656_s28  }
  0x23   :  { %1648 = dma.done.wait [#allocation3], 256  }
  0x24   :  { %1649 = vsyncadd [#allocation3], 4294967040 }
  0x25   :  { %1650 = dma.done.wait [#allocation6], 256  }
  0x26   :  { %1651 = vsyncadd [#allocation6], 4294967040  ;;  %v1658_v0 = vmov 0.0   ;;  %vm1659_vm0 = vmmov 0   ;;  %v1518_v1 = vld [vmem:[%s2101_s4] sm:$0xff]   ;;  %v1519_v2 = vld [vmem:[%s2101_s4 + $0x8] sm:$0xff]  }
  0x27   :  { %1368 = vmatprep.subr.bf16.mxu1 %v1658_v0  ;;  %1376 = vmatprep.mubr.msk.bf16.mxu1 %vm1659_vm0, %v1658_v0  ;;  %v1520_v3 = vld [vmem:[%s2101_s4 + $0x10] sm:$0xff]   ;;  %v1521_v4 = vld [vmem:[%s2101_s4 + $0x18] sm:$0xff]   ;;  %v67_v5 = vld [vmem:[%s2097_s0] sm:$0xff]  ;;  %vm106_vm1 = vcmask 523264   ;;  %vm154_vm2 = vcmask 261120   ;;  %s1660_s4 = smov 96  }
  0x28   :  { %1380 = vmatprep.subr.bf16.mxu0 %v1658_v0  ;;  %1382 = vmatprep.mubr.msk.bf16.mxu0 %vm1659_vm0, %v1658_v0  ;;  %v68_v6 = vld [vmem:[%s2097_s0 + $0x8] sm:$0xff]  ;;  %v1525_v18 = vld [vmem:[%s2104_s7 + $0x10] ss:$8 sps:$4 sm:$0xff]   ;;  %v1527_v19 = vld [vmem:[%s2104_s7 + $0x14] ss:$8 sps:$4 sm:$0xff]   ;;  %v1661_v20 = vmov 0  }
  0x29   :  { %1369 = vmatpush3.bf16.msra.mxu1 %v1518_v1  ;;  %v81_v7 = vpack.c.bf16 %v68_v6, %v67_v5  ;;  %v1524_v16 = vld [vmem:[%s2104_s7 + $0x4] ss:$8 sps:$4 sm:$0xff]   ;;  %v1522_v17 = vld [vmem:[%s2104_s7] ss:$8 sps:$4 sm:$0xff]   ;;  %s1662_s2 = smov 32   ;;  %s1663_s7 = smov 64  }
  0x2a   :  { %1370 = vmatprep.subr.bf16.mxu1 %v1658_v0  ;;  %v1299_v25 = vld [vmem:[%s2103_s6] ss:$0 sm:$0xff]  ;;  %v1530_v42 = vld [vmem:[%s2105_s8 + $0x4] ss:$8 sps:$4 sm:$0xff]   ;;  %v1533_v43 = vld [vmem:[%s2105_s8 + $0x14] ss:$8 sps:$4 sm:$0xff]  }
  0x2b   :  { %v1816_v26 = vld [vmem:[#allocation2] sm:$0xff]  ;;  %v1531_v46 = vld [vmem:[%s2105_s8 + $0x10] ss:$8 sps:$4 sm:$0xff]   ;;  %v70_v61 = vld [vmem:[#allocation2 + $0x8] sm:$0xff]  ;;  %s1665_s16 = smov 112   ;;  %vm415_vm3 = vcmask 130048  }
  0x2c   :  { %v1298_v36 = vld [vmem:[%s2102_s5] ss:$0 sm:$0xff]  ;;  %v71_v59 = vld [vmem:[#allocation5] sm:$0xff]  ;;  %v72_v60 = vld [vmem:[#allocation5 + $0x8] sm:$0xff]  ;;  %s1667_s21 = smov 48   ;;  %vm1266_vm4 = vcmask 392192  }
  0x2d   :  { %1371 = vmatpush3.bf16.msra.mxu1 %v1519_v2  ;;  %v1528_v41 = vld [vmem:[%s2105_s8] ss:$8 sps:$4 sm:$0xff]   ;;  %s1664_s8 = smov 80   ;;  %vm1127_vm5 = vcmask 785408  }
  0x2e   :  { %1372 = vmatprep.subr.bf16.mxu1 %v1658_v0 }
  0x31   :  { %1373 = vmatpush3.bf16.msra.mxu1 %v1520_v3 }
  0x32   :  { %1374 = vmatprep.subr.bf16.mxu1 %v1658_v0 }
  0x35   :  { %1375 = vmatpush3.bf16.msra.mxu1 %v1521_v4 }
  0x36   :  { %269 = vmatprep.subr.bf16.mxu1 %v1524_v16 }
  0x38   :  { %1377 = vmatmul.mubr.msk.bf16.vlgmr.msra.gmra.mrb[0].mxu1 %vm106_vm1, %v81_v7 }
  0x39   :  { %270 = vmatpush1.bf16.msra.mxu1 %v1522_v17  ;;  %301 = vmatprep.mubr.bf16.mxu1 %v1661_v20 }
  0x3a   :  { %271 = vmatprep.subr.bf16.mxu1 %v1527_v19 }
  0x3d   :  { %272 = vmatpush1.bf16.msra.mxu1 %v1525_v18 }
  0x3e   :  { %363 = vmatprep.subr.bf16.mxu1 %v1530_v42 }
 0x10b   :  { %v1787_v8 = vpop.f32.mrb[0].mxu1 }
 0x10c   :  { %v1378_v9 = vpop.f32.mrb[1].mxu1  ;;  %v152_v10 = vmul.f32 %v1787_v8, %v1787_v8 }
 0x10d   :  { %v1791_v11 = vpop.f32.mrb[2].mxu1 }
 0x10e   :  { %181 = vrot.lane.b32.xlu0 %v152_v10, %s1660_s4  ;;  %v1379_v12 = vpop.f32.mrb[3].mxu1  ;;  %v155_v13 = vsel %vm154_vm2, %v152_v10, 0.0  ;;  %v153_v14 = vmul.f32 %v1791_v11, %v1791_v11 }
 0x10f   :  { %156 = vadd.xlane.f32.xlu1 %v155_v13 }
 0x110   :  { %v158_v15 = vsel %vm154_vm2, %v153_v14, 0.0 }
 0x112   :  { %183 = vrot.lane.b32.xlu0 %v153_v14, %s1660_s4 }
 0x113   :  { %159 = vadd.xlane.f32.xlu1 %v158_v15 }
 0x180   :  { %v182_v21 = vpop.permute.xlu0 %181 }
 0x181   :  { %v187_v22 = vsel %vm154_vm2, %v182_v21, 0.0 }
 0x182   :  { %188 = vadd.xlane.f32.xlu0 %v187_v22 }
 0x184   :  { %v184_v23 = vpop.permute.xlu0 %183 }
 0x185   :  { %v190_v24 = vsel %vm154_vm2, %v184_v23, 0.0 }
 0x186   :  { %191 = vadd.xlane.f32.xlu1 %v190_v24 }
 0x197   :  { %206 = vrot.lane.b32.xlu1 %v1299_v25, %s1662_s2 }
 0x198   :  { %213 = vrot.lane.b32.xlu0 %v1816_v26, %s1663_s7 }
 0x19c   :  { %v157_v27 = vpop.xlane.xlu1 %156 }
 0x19d   :  { %v162_v28 = vmul.f32 0.03125, %v157_v27 }
 0x19f   :  { %v164_v29 = vadd.f32 1e-06, %v162_v28 }
 0x1a0   :  { %v160_v30 = vpop.xlane.xlu1 %159 }
 0x1a1   :  { %1542 = vrsqrt.f32 %v164_v29  ;;  %v163_v31 = vmul.f32 0.03125, %v160_v30 }
 0x1a3   :  { %v165_v32 = vadd.f32 1e-06, %v163_v31 }
 0x1a5   :  { %1544 = vrsqrt.f32 %v165_v32 }
 0x1ab   :  { %v1543_v33 = vpop.eup %1542 }
 0x1ac   :  { %v168_v34 = vmul.f32 %v1543_v33, %v1787_v8 }
 0x1ae   :  { %v176_v38 = vmul.f32 %v1298_v36, %v168_v34 }
 0x1af   :  { %v1545_v35 = vpop.eup %1544 }
 0x1b0   :  { %v169_v37 = vmul.f32 %v1545_v35, %v1791_v11 }
 0x1b2   :  { %v177_v39 = vmul.f32 %v1298_v36, %v169_v37 }
 0x1b4   :  { %v245_v40 = vpack.c.bf16 %v177_v39, %v176_v38  ;;  %v1890_v39 = vld [vmem:[%s2100_s3] sm:$0xff] }
 0x1b6   :  { %1304 = vmatmul.mubr.msk.bf16.vlgmr.msra.gmra.mrb[4].mxu1 %vm154_vm2, %v245_v40 }
 0x1b7   :  { %395 = vmatprep.mubr.bf16.mxu1 %v1661_v20  ;;  %364 = vmatpush1.bf16.msra.mxu1 %v1528_v41 }
 0x1b8   :  { %365 = vmatprep.subr.bf16.mxu1 %v1533_v43  ;;  %v1895_v43 = vld [vmem:[%s2100_s3 + $0x8] sm:$0xff]  ;;  %s1666_s3 = smov 16  }
 0x1bb   :  { %366 = vmatpush1.bf16.msra.mxu1 %v1531_v46 }
 0x1bc   :  { %1392 = vmatprep.subr.bf16.mxu1 %v1658_v0 }
 0x20f   :  { %v189_v44 = vpop.xlane.xlu0 %188 }
 0x210   :  { %v193_v45 = vmul.f32 0.03125, %v189_v44 }
 0x212   :  { %v195_v47 = vadd.f32 1e-06, %v193_v45 }
 0x213   :  { %v192_v48 = vpop.xlane.xlu1 %191  ;;  %v214_v12 = vpop.permute.xlu0 %213 }
 0x214   :  { %1546 = vrsqrt.f32 %v195_v47  ;;  %v194_v49 = vmul.f32 0.03125, %v192_v48  ;;  %v219_v14 = vmul.f32 %v214_v12, %v1787_v8 }
 0x216   :  { %v196_v50 = vadd.f32 1e-06, %v194_v49 }
 0x217   :  { %v207_v54 = vpop.permute.xlu1 %206 }
 0x218   :  { %1548 = vrsqrt.f32 %v196_v50 }
 0x21e   :  { %v1547_v51 = vpop.eup %1546 }
 0x21f   :  { %v199_v52 = vmul.f32 %v1547_v51, %v1787_v8 }
 0x221   :  { %v209_v56 = vmul.f32 %v207_v54, %v199_v52 }
 0x222   :  { %v1549_v53 = vpop.eup %1548 }
 0x223   :  { %v200_v55 = vmul.f32 %v1549_v53, %v1791_v11 }
 0x225   :  { %v210_v57 = vmul.f32 %v207_v54, %v200_v55 }
 0x227   :  { %v336_v58 = vpack.c.bf16 %v210_v57, %v209_v56 }
 0x229   :  { %338 = vrot.lane.b32.xlu1 %v336_v58, %s1660_s4 }
 0x22d   :  { %223 = vrot.lane.b32.xlu1 %v71_v59, %s1664_s8 }
 0x231   :  { %225 = vrot.lane.b32.xlu1 %v72_v60, %s1664_s8 }
 0x235   :  { %215 = vrot.lane.b32.xlu1 %v70_v61, %s1663_s7 }
 0x289   :  { %v303_v62 = vpop.f32.mrb[4].mxu1 }
 0x28a   :  { %v305_v63 = vpop.f32.mrb[5].mxu1 }
 0x28b   :  { %v307_v1 = vpop.f32.mrb[6].mxu1  ;;  %v312_v32 = vmul.f32 %v305_v63, %v1816_v26 }
 0x28c   :  { %v1846_v2 = vpack.c.bf16 %v307_v1, %v303_v62  ;;  %v309_v3 = vpop.f32.mrb[7].mxu1 }
 0x28d   :  { %v313_v33 = vmul.f32 %v309_v3, %v70_v61 }
 0x29b   :  { %v339_v4 = vpop.permute.xlu1 %338 }
 0x29c   :  { %1309 = vmatmul.mubr.msk.bf16.vlgmr.msra.gmra.mrb[8].mxu1 %vm154_vm2, %v339_v4 }
 0x29d   :  { %1394 = vmatprep.mubr.msk.bf16.mxu1 %vm1659_vm0, %v1658_v0 }
 0x29f   :  { %v224_v5 = vpop.permute.xlu1 %223 }
 0x2a0   :  { %v229_v6 = vmul.f32 %v224_v5, %v1787_v8 }
 0x2a2   :  { %233 = vrot.lane.b32.xlu1 %v229_v6, %s1665_s16 }
 0x2a3   :  { %v226_v7 = vpop.permute.xlu1 %225 }
 0x2a4   :  { %v230_v9 = vmul.f32 %v226_v7, %v1791_v11 }
 0x2a6   :  { %235 = vrot.lane.b32.xlu1 %v230_v9, %s1665_s16 }
 0x2a7   :  { %v216_v10 = vpop.permute.xlu1 %215 }
 0x2a8   :  { %v220_v15 = vmul.f32 %v216_v10, %v1791_v11 }
 0x2aa   :  { %314 = vrot.lane.b32.xlu1 %v71_v59, %s1663_s7 }
 0x2ae   :  { %316 = vrot.lane.b32.xlu1 %v72_v60, %s1663_s7 }
 0x314   :  { %v234_v13 = vpop.permute.xlu1 %233 }
 0x315   :  { %v239_v17 = vadd.f32 %v234_v13, %v219_v14 }
 0x318   :  { %v236_v16 = vpop.permute.xlu1 %235 }
 0x319   :  { %v240_v18 = vadd.f32 %v236_v16, %v220_v15 }
 0x31b   :  { %v411_v19 = vpack.c.bf16 %v240_v18, %v239_v17 }
 0x31c   :  { %v315_v20 = vpop.permute.xlu1 %314 }
 0x31d   :  { %v320_v21 = vmul.f32 %v315_v20, %v305_v63  ;;  %413 = vrot.lane.b32.xlu0 %v411_v19, %s1663_s7 }
 0x31f   :  { %324 = vrot.lane.b32.xlu1 %v320_v21, %s1663_s7 }
 0x320   :  { %v317_v22 = vpop.permute.xlu1 %316 }
 0x321   :  { %v321_v23 = vmul.f32 %v317_v22, %v309_v3 }
 0x323   :  { %326 = vrot.lane.b32.xlu0 %v321_v23, %s1663_s7 }
 0x36f   :  { %v397_v24 = vpop.f32.mrb[8].mxu1 }
 0x370   :  { %v399_v25 = vpop.f32.mrb[9].mxu1 }
 0x371   :  { %v401_v27 = vpop.f32.mrb[10].mxu1 }
 0x372   :  { %v1862_v8 = vpack.c.bf16 %v401_v27, %v397_v24  ;;  %v403_v11 = vpop.f32.mrb[11].mxu1 }
 0x373   :  { %v1864_v28 = vpack.c.bf16 %v403_v11, %v399_v25 }
 0x374   :  { %v467_v38 = vsel %vm154_vm2, %v1862_v8, 0 }
 0x375   :  { %1393 = vmatpush3.bf16.msra.mxu1 %v1864_v28 }
 0x376   :  { %1398 = vmatprep.subr.bf16.mxu1 %v1658_v0 }
 0x38f   :  { %v414_v29 = vpop.permute.xlu0 %413 }
 0x390   :  { %v1869_v30 = vsel %vm415_vm3, %v414_v29, 0 }
 0x391   :  { %1381 = vmatpush3.bf16.xpose.msra.mxu0 %v1869_v30  ;;  %v325_v31 = vpop.permute.xlu1 %324 }
 0x392   :  { %1386 = vmatprep.subr.bf16.mxu0 %v1658_v0  ;;  %v330_v35 = vadd.f32 %v325_v31, %v312_v32 }
 0x395   :  { %v327_v34 = vpop.permute.xlu0 %326 }
 0x396   :  { %v331_v36 = vadd.f32 %v327_v34, %v313_v33 }
 0x398   :  { %v1874_v37 = vpack.c.bf16 %v331_v36, %v330_v35 }
 0x39a   :  { %1383 = vmatmul.mubr.msk.bf16.vlgmr.msra.gmra.mrb[0].mxu0 %vm415_vm3, %v1874_v37 }
 0x39b   :  { %1387 = vmatpush3.bf16.xpose.msra.mxu0 %v467_v38  ;;  %1388 = vmatprep.mubr.msk.bf16.mxu0 %vm1659_vm0, %v1658_v0 }
 0x39c   :  { %1410 = vmatprep.subr.bf16.mxu0 %v1658_v0 }
 0x3a6   :  { %1389 = vmatmul.mubr.msk.bf16.vlgmr.msra.gmra.mrb[0].mxu0 %vm154_vm2, %v1846_v2 }
 0x3a7   :  { %1412 = vmatprep.mubr.msk.bf16.mxu0 %vm1659_vm0, %v1658_v0 }
 0x479   :  { %v503_v26 = vpop.f32.mrb[0].mxu0 }
 0x47a   :  { %v510_v40 = vmul.f32 0.14433756, %v503_v26  ;;  %v1390_v41 = vpop.f32.mrb[1].mxu0 }
 0x47b   :  { %v506_v42 = vpop.f32.mrb[2].mxu0 }
 0x47c   :  { %v511_v44 = vmul.f32 0.14433756, %v506_v42  ;;  %v1391_v45 = vpop.f32.mrb[3].mxu0  ;;  %v512_v46 = vadd.f32 %v510_v40, %v1890_v39 }
 0x47e   :  { %v514_v47 = vsel %vm415_vm3, %v512_v46, -inf  ;;  %v513_v48 = vadd.f32 %v511_v44, %v1895_v43 }
 0x47f   :  { %515 = vmax.xlane.f32.xlu1 %v514_v47 }
 0x480   :  { %v517_v49 = vsel %vm415_vm3, %v513_v48, -inf }
 0x481   :  { %518 = vmax.xlane.f32.xlu0 %v517_v49 }
 0x50c   :  { %v516_v50 = vpop.xlane.xlu1 %515 }
 0x50d   :  { %v520_v51 = vsub.f32 %v512_v46, %v516_v50 }
 0x50e   :  { %v519_v52 = vpop.xlane.xlu0 %518 }
 0x50f   :  { %v522_v53 = vmul.f32 1.442695, %v520_v51  ;;  %v521_v54 = vsub.f32 %v513_v48, %v519_v52 }
 0x511   :  { %1550 = vpow2.f32 %v522_v53  ;;  %v524_v55 = vmul.f32 1.442695, %v521_v54 }
 0x513   :  { %1552 = vpow2.f32 %v524_v55 }
 0x51b   :  { %v1551_v56 = vpop.eup %1550 }
 0x51c   :  { %v526_v57 = vsel %vm415_vm3, %v1551_v56, 0.0 }
 0x51d   :  { %v1553_v58 = vpop.eup %1552  ;;  %527 = vadd.xlane.f32.xlu0 %v526_v57 }
 0x51e   :  { %v529_v59 = vsel %vm415_vm3, %v1553_v58, 0.0 }
 0x51f   :  { %530 = vadd.xlane.f32.xlu1 %v529_v59 }
 0x530   :  { %633 = vrot.lane.b32.xlu1 %v1862_v8, %s1660_s4 }
 0x533   :  { %583 = vrot.lane.b32.xlu0 %v1874_v37, %s1665_s16 }
 0x534   :  { %630 = vrot.lane.b32.xlu1 %v1846_v2, %s1660_s4 }
 0x5aa   :  { %v528_v60 = vpop.xlane.xlu0 %527 }
 0x5ab   :  { %1554 = vrcp.f32 %v528_v60 }
 0x5ac   :  { %v531_v61 = vpop.xlane.xlu1 %530 }
 0x5ad   :  { %1556 = vrcp.f32 %v531_v61 }
 0x5ae   :  { %v584_v6 = vpop.permute.xlu0 %583 }
 0x5b0   :  { %v634_v5 = vpop.permute.xlu1 %633 }
 0x5b1   :  { %v639_v7 = vsel %vm154_vm2, %v634_v5, 0 }
 0x5b4   :  { %v631_v9 = vpop.permute.xlu1 %630 }
 0x5b5   :  { %v1555_v62 = vpop.eup %1554 }
 0x5b6   :  { %v1909_v1 = vmul.f32 %v1555_v62, %v1551_v56 }
 0x5b7   :  { %v1557_v63 = vpop.eup %1556 }
 0x5b8   :  { %v1911_v3 = vmul.f32 %v1557_v63, %v1553_v58 }
 0x5ba   :  { %v536_v4 = vpack.c.bf16 %v1911_v3, %v1909_v1 }
 0x5bc   :  { %1395 = vmatmul.mubr.msk.bf16.vlgmr.msra.gmra.mrb[12].mxu1 %vm415_vm3, %v536_v4 }
 0x5bd   :  { %1399 = vmatpush3.bf16.xpose.msra.mxu1 %v1869_v30  ;;  %1400 = vmatprep.mubr.msk.bf16.mxu1 %vm1659_vm0, %v1658_v0 }
 0x5be   :  { %1404 = vmatprep.subr.bf16.mxu1 %v1658_v0 }
 0x5c4   :  { %1401 = vmatmul.mubr.msk.bf16.vlgmr.msra.gmra.mrb[16].mxu1 %vm415_vm3, %v584_v6 }
 0x5c5   :  { %1405 = vmatpush3.bf16.xpose.msra.mxu1 %v639_v7  ;;  %1406 = vmatprep.mubr.msk.bf16.mxu1 %vm1659_vm0, %v1658_v0 }
 0x5c6   :  { %1428 = vmatprep.subr.bf16.mxu1 %v1658_v0 }
 0x5d0   :  { %1407 = vmatmul.mubr.msk.bf16.vlgmr.msra.gmra.mrb[16].mxu1 %vm154_vm2, %v631_v9 }
 0x5d1   :  { %1430 = vmatprep.mubr.msk.bf16.mxu1 %vm1659_vm0, %v1658_v0 }
 0x68f   :  { %v1928_v10 = vpop.f32.mrb[12].mxu1 }
 0x690   :  { %v1396_v12 = vpop.f32.mrb[13].mxu1 }
 0x691   :  { %v1930_v13 = vpop.f32.mrb[14].mxu1 }
 0x692   :  { %v1397_v14 = vpop.f32.mrb[15].mxu1 }
 0x6a3   :  { %v675_v15 = vpop.f32.mrb[16].mxu1 }
 0x6a4   :  { %v682_v16 = vmul.f32 0.14433756, %v675_v15  ;;  %v1408_v17 = vpop.f32.mrb[17].mxu1 }
 0x6a5   :  { %v678_v18 = vpop.f32.mrb[18].mxu1 }
 0x6a6   :  { %v683_v19 = vmul.f32 0.14433756, %v678_v18  ;;  %v1409_v20 = vpop.f32.mrb[19].mxu1  ;;  %v684_v21 = vadd.f32 %v682_v16, %v1890_v39 }
 0x6a8   :  { %v686_v22 = vsel %vm415_vm3, %v684_v21, -inf  ;;  %v685_v23 = vadd.f32 %v683_v19, %v1895_v43 }
 0x6a9   :  { %687 = vmax.xlane.f32.xlu0 %v686_v22 }
 0x6aa   :  { %v689_v24 = vsel %vm415_vm3, %v685_v23, -inf }
 0x6ab   :  { %690 = vmax.xlane.f32.xlu1 %v689_v24 }
 0x6bc   :  { %710 = vrot.lane.b32.xlu1 %v1864_v28, %s1660_s4 }
 0x6c0   :  { %805 = vrot.lane.b32.xlu1 %v1862_v8, %s1663_s7 }
 0x6c4   :  { %803 = vrot.lane.b32.xlu1 %v1846_v2, %s1663_s7 }
 0x736   :  { %v688_v25 = vpop.xlane.xlu0 %687 }
 0x737   :  { %v692_v27 = vsub.f32 %v684_v21, %v688_v25 }
 0x738   :  { %v691_v11 = vpop.xlane.xlu1 %690 }
 0x739   :  { %v694_v29 = vmul.f32 1.442695, %v692_v27  ;;  %v693_v31 = vsub.f32 %v685_v23, %v691_v11 }
 0x73b   :  { %1558 = vpow2.f32 %v694_v29  ;;  %v696_v32 = vmul.f32 1.442695, %v693_v31 }
 0x73c   :  { %v711_v33 = vpop.permute.xlu1 %710 }
 0x73d   :  { %1560 = vpow2.f32 %v696_v32  ;;  %1411 = vmatpush3.bf16.msra.mxu0 %v711_v33 }
 0x73e   :  { %1416 = vmatprep.subr.bf16.mxu0 %v1658_v0 }
 0x740   :  { %v806_v47 = vpop.permute.xlu1 %805 }
 0x741   :  { %v811_v49 = vsel %vm154_vm2, %v806_v47, 0 }
 0x744   :  { %v804_v50 = vpop.permute.xlu1 %803 }
 0x745   :  { %v1559_v34 = vpop.eup %1558 }
 0x746   :  { %v698_v35 = vsel %vm415_vm3, %v1559_v34, 0.0 }
 0x747   :  { %v1561_v36 = vpop.eup %1560  ;;  %699 = vadd.xlane.f32.xlu0 %v698_v35 }
 0x748   :  { %v701_v38 = vsel %vm415_vm3, %v1561_v36, 0.0 }
 0x74b   :  { %702 = vadd.xlane.f32.xlu0 %v701_v38 }
 0x761   :  { %757 = vrot.lane.b32.xlu0 %v1874_v37, %s1660_s4 }
 0x7d4   :  { %v700_v26 = vpop.xlane.xlu0 %699 }
 0x7d5   :  { %1562 = vrcp.f32 %v700_v26 }
 0x7d8   :  { %v703_v40 = vpop.xlane.xlu0 %702 }
 0x7d9   :  { %1564 = vrcp.f32 %v703_v40 }
 0x7dc   :  { %v758_v48 = vpop.permute.xlu0 %757 }
 0x7df   :  { %v1563_v41 = vpop.eup %1562 }
 0x7e0   :  { %v1947_v44 = vmul.f32 %v1563_v41, %v1559_v34 }
 0x7e3   :  { %v1565_v42 = vpop.eup %1564 }
 0x7e4   :  { %v1949_v45 = vmul.f32 %v1565_v42, %v1561_v36 }
 0x7e6   :  { %v708_v46 = vpack.c.bf16 %v1949_v45, %v1947_v44 }
 0x7e8   :  { %1413 = vmatmul.mubr.msk.bf16.vlgmr.msra.gmra.mrb[4].mxu0 %vm415_vm3, %v708_v46 }
 0x7e9   :  { %1417 = vmatpush3.bf16.xpose.msra.mxu0 %v1869_v30  ;;  %1418 = vmatprep.mubr.msk.bf16.mxu0 %vm1659_vm0, %v1658_v0 }
 0x7ea   :  { %1422 = vmatprep.subr.bf16.mxu0 %v1658_v0 }
 0x7f0   :  { %1419 = vmatmul.mubr.msk.bf16.vlgmr.msra.gmra.mrb[8].mxu0 %vm415_vm3, %v758_v48 }
 0x7f1   :  { %1423 = vmatpush3.bf16.xpose.msra.mxu0 %v811_v49  ;;  %1424 = vmatprep.mubr.msk.bf16.mxu0 %vm1659_vm0, %v1658_v0 }
 0x7f2   :  { %1446 = vmatprep.subr.bf16.mxu0 %v1658_v0 }
 0x7fc   :  { %1425 = vmatmul.mubr.msk.bf16.vlgmr.msra.gmra.mrb[8].mxu0 %vm154_vm2, %v804_v50 }
 0x7fd   :  { %1448 = vmatprep.mubr.msk.bf16.mxu0 %vm1659_vm0, %v1658_v0 }
 0x8bb   :  { %v1966_v51 = vpop.f32.mrb[4].mxu0 }
 0x8bc   :  { %v1414_v52 = vpop.f32.mrb[5].mxu0 }
 0x8bd   :  { %v1968_v53 = vpop.f32.mrb[6].mxu0 }
 0x8be   :  { %v1503_v54 = vpack.i.bf16 %v1968_v53, %v1966_v51  ;;  %v1415_v55 = vpop.f32.mrb[7].mxu0 }
 0x8cf   :  { %v847_v56 = vpop.f32.mrb[8].mxu0 }
 0x8d0   :  { %v854_v57 = vmul.f32 0.14433756, %v847_v56  ;;  %v1426_v58 = vpop.f32.mrb[9].mxu0 }
 0x8d1   :  { %v850_v59 = vpop.f32.mrb[10].mxu0 }
 0x8d2   :  { %v855_v60 = vmul.f32 0.14433756, %v850_v59  ;;  %v1427_v61 = vpop.f32.mrb[11].mxu0  ;;  %v856_v62 = vadd.f32 %v854_v57, %v1890_v39 }
 0x8d4   :  { %v858_v63 = vsel %vm415_vm3, %v856_v62, -inf  ;;  %v857_v4 = vadd.f32 %v855_v60, %v1895_v43 }
 0x8d5   :  { %859 = vmax.xlane.f32.xlu0 %v858_v63 }
 0x8d6   :  { %v861_v5 = vsel %vm415_vm3, %v857_v4, -inf }
 0x8d7   :  { %862 = vmax.xlane.f32.xlu1 %v861_v5 }
 0x8e8   :  { %881 = vrot.lane.b32.xlu1 %v1864_v28, %s1663_s7 }
 0x8ec   :  { %976 = vrot.lane.b32.xlu1 %v1862_v8, %s1662_s2 }
 0x8f0   :  { %974 = vrot.lane.b32.xlu1 %v1846_v2, %s1662_s2 }
 0x962   :  { %v860_v6 = vpop.xlane.xlu0 %859 }
 0x963   :  { %v864_v7 = vsub.f32 %v856_v62, %v860_v6 }
 0x964   :  { %v863_v9 = vpop.xlane.xlu1 %862 }
 0x965   :  { %v866_v12 = vmul.f32 1.442695, %v864_v7  ;;  %v865_v14 = vsub.f32 %v857_v4, %v863_v9 }
 0x967   :  { %1566 = vpow2.f32 %v866_v12  ;;  %v868_v15 = vmul.f32 1.442695, %v865_v14  ;;  %v1536_v14 = vld [vmem:[%s2106_s9 + $0x10] sm:$0xff]  }
 0x968   :  { %v882_v16 = vpop.permute.xlu1 %881 }
 0x969   :  { %1568 = vpow2.f32 %v868_v15  ;;  %1429 = vmatpush3.bf16.msra.mxu1 %v882_v16 }
 0x96a   :  { %1434 = vmatprep.subr.bf16.mxu1 %v1658_v0 }
 0x971   :  { %v1567_v17 = vpop.eup %1566 }
 0x972   :  { %v870_v18 = vsel %vm415_vm3, %v1567_v17, 0.0 }
 0x973   :  { %v1569_v19 = vpop.eup %1568  ;;  %871 = vadd.xlane.f32.xlu0 %v870_v18 }
 0x974   :  { %v873_v8 = vsel %vm415_vm3, %v1569_v19, 0.0 }
 0x977   :  { %874 = vadd.xlane.f32.xlu0 %v873_v8  ;;  %v1539_v8 = vld [vmem:[%s2106_s9 + $0x28] sm:$0xff]  }
 0x98d   :  { %928 = vrot.lane.b32.xlu0 %v1874_v37, %s1664_s8  ;;  %v977_v37 = vpop.permute.xlu1 %976 }
 0x98e   :  { %v982_v11 = vsel %vm154_vm2, %v977_v37, 0 }
 0x991   :  { %v975_v29 = vpop.permute.xlu1 %974 }
 0xa00   :  { %v872_v2 = vpop.xlane.xlu0 %871 }
 0xa01   :  { %1570 = vrcp.f32 %v872_v2  ;;  %v1540_v2 = vld [vmem:[%s2106_s9 + $0x30] sm:$0xff]  }
 0xa04   :  { %v875_v20 = vpop.xlane.xlu0 %874 }
 0xa05   :  { %1572 = vrcp.f32 %v875_v20  ;;  %v1541_v20 = vld [vmem:[%s2106_s9 + $0x38] sm:$0xff]  }
 0xa08   :  { %v929_v27 = vpop.permute.xlu0 %928 }
 0xa0b   :  { %v1571_v21 = vpop.eup %1570 }
 0xa0c   :  { %v878_v23 = vmul.f32 %v1571_v21, %v1567_v17 }
 0xa0f   :  { %v1573_v22 = vpop.eup %1572 }
 0xa10   :  { %v1987_v24 = vmul.f32 %v1573_v22, %v1569_v19  ;;  %v1537_v19 = vld [vmem:[%s2106_s9 + $0x18] sm:$0xff]  }
 0xa12   :  { %v880_v25 = vpack.c.bf16 %v1987_v24, %v878_v23 }
 0xa14   :  { %1431 = vmatmul.mubr.msk.bf16.vlgmr.msra.gmra.mrb[20].mxu1 %vm415_vm3, %v880_v25 }
 0xa15   :  { %1435 = vmatpush3.bf16.xpose.msra.mxu1 %v1869_v30  ;;  %1436 = vmatprep.mubr.msk.bf16.mxu1 %vm1659_vm0, %v1658_v0 }
 0xa16   :  { %1440 = vmatprep.subr.bf16.mxu1 %v1658_v0 }
 0xa1c   :  { %1437 = vmatmul.mubr.msk.bf16.vlgmr.msra.gmra.mrb[24].mxu1 %vm415_vm3, %v929_v27 }
 0xa1d   :  { %1441 = vmatpush3.bf16.xpose.msra.mxu1 %v982_v11  ;;  %1442 = vmatprep.mubr.msk.bf16.mxu1 %vm1659_vm0, %v1658_v0 }
 0xa28   :  { %1443 = vmatmul.mubr.msk.bf16.vlgmr.msra.gmra.mrb[24].mxu1 %vm154_vm2, %v975_v29 }
 0xae7   :  { %v921_v31 = vpop.f32.mrb[20].mxu1 }
 0xae8   :  { %v1432_v30 = vpop.f32.mrb[21].mxu1 }
 0xae9   :  { %v924_v32 = vpop.f32.mrb[22].mxu1 }
 0xaea   :  { %v1508_v33 = vpack.i.bf16 %v924_v32, %v921_v31  ;;  %v1433_v34 = vpop.f32.mrb[23].mxu1 }
 0xafb   :  { %v1018_v35 = vpop.f32.mrb[24].mxu1 }
 0xafc   :  { %v1025_v36 = vmul.f32 0.14433756, %v1018_v35  ;;  %v1444_v38 = vpop.f32.mrb[25].mxu1 }
 0xafd   :  { %v1021_v26 = vpop.f32.mrb[26].mxu1 }
 0xafe   :  { %v1026_v40 = vmul.f32 0.14433756, %v1021_v26  ;;  %v1445_v41 = vpop.f32.mrb[27].mxu1  ;;  %v1027_v42 = vadd.f32 %v1025_v36, %v1890_v39 }
 0xb00   :  { %v1029_v46 = vsel %vm415_vm3, %v1027_v42, -inf  ;;  %v1028_v47 = vadd.f32 %v1026_v40, %v1895_v43 }
 0xb01   :  { %1030 = vmax.xlane.f32.xlu0 %v1029_v46 }
 0xb02   :  { %v1032_v48 = vsel %vm415_vm3, %v1028_v47, -inf }
 0xb03   :  { %1033 = vmax.xlane.f32.xlu1 %v1032_v48 }
 0xb14   :  { %1052 = vrot.lane.b32.xlu1 %v1864_v28, %s1662_s2 }
 0xb18   :  { %1509 = vrot.lane.b32.xlu1 %v1508_v33, %s1663_s7 }
 0xb8e   :  { %v1031_v49 = vpop.xlane.xlu0 %1030 }
 0xb8f   :  { %v1035_v50 = vsub.f32 %v1027_v42, %v1031_v49 }
 0xb90   :  { %v1034_v52 = vpop.xlane.xlu1 %1033 }
 0xb91   :  { %v1037_v55 = vmul.f32 1.442695, %v1035_v50  ;;  %v1036_v56 = vsub.f32 %v1028_v47, %v1034_v52 }
 0xb93   :  { %1574 = vpow2.f32 %v1037_v55  ;;  %v1039_v39 = vmul.f32 1.442695, %v1036_v56 }
 0xb94   :  { %v1053_v57 = vpop.permute.xlu1 %1052 }
 0xb95   :  { %1576 = vpow2.f32 %v1039_v39  ;;  %1447 = vmatpush3.bf16.msra.mxu0 %v1053_v57 }
 0xb96   :  { %1452 = vmatprep.subr.bf16.mxu0 %v1658_v0 }
 0xb9d   :  { %v1575_v43 = vpop.eup %1574 }
 0xb9e   :  { %v1041_v58 = vsel %vm415_vm3, %v1575_v43, 0.0 }
 0xb9f   :  { %v1577_v59 = vpop.eup %1576  ;;  %1042 = vadd.xlane.f32.xlu0 %v1041_v58 }
 0xba0   :  { %v1044_v28 = vsel %vm415_vm3, %v1577_v59, 0.0 }
 0xba3   :  { %1045 = vadd.xlane.f32.xlu0 %v1044_v28 }
 0xbb9   :  { %1504 = vrot.lane.b32.xlu0 %v1503_v54, %s1662_s2 }
 0xbbd   :  { %1240 = vrot.lane.b32.xlu0 %v1947_v44, %s1666_s3 }
 0xbc1   :  { %1248 = vrot.lane.b32.xlu0 %v878_v23, %s1662_s2 }
 0xc2c   :  { %v1043_v60 = vpop.xlane.xlu0 %1042 }
 0xc2d   :  { %1578 = vrcp.f32 %v1043_v60 }
 0xc30   :  { %v1046_v61 = vpop.xlane.xlu0 %1045 }
 0xc31   :  { %1580 = vrcp.f32 %v1046_v61 }
 0xc34   :  { %v1505_v62 = vpop.permute.xlu0 %1504 }
 0xc35   :  { %v1507_v63 = vunpack.i.h.bf16 %v1505_v62  ;;  %v1506_v4 = vunpack.i.l.bf16 %v1505_v62 }
 0xc37   :  { %v1579_v5 = vpop.eup %1578  ;;  %v1124_v6 = vsel %vm154_vm2, %v1930_v13, %v1507_v63  ;;  %v1123_v51 = vsel %vm154_vm2, %v1928_v10, %v1506_v4  ;;  %v1534_v13 = vld [vmem:[%s2106_s9] sm:$0xff]   ;;  %v1535_v10 = vld [vmem:[%s2106_s9 + $0x8] sm:$0xff]  }
 0xc38   :  { %v1049_v53 = vmul.f32 %v1579_v5, %v1575_v43  ;;  %v1241_v9 = vpop.permute.xlu0 %1240 }
 0xc39   :  { %v1262_v15 = vsel %vm415_vm3, %v1909_v1, %v1241_v9  ;;  %v1538_v1 = vld [vmem:[%s2106_s9 + $0x20] sm:$0xff]  }
 0xc3a   :  { %1256 = vrot.lane.b32.xlu0 %v1049_v53, %s1667_s21 }
 0xc3b   :  { %v1581_v44 = vpop.eup %1580 }
 0xc3c   :  { %v1050_v54 = vmul.f32 %v1581_v44, %v1577_v59  ;;  %v1249_v12 = vpop.permute.xlu0 %1248 }
 0xc3d   :  { %v1264_v16 = vsel %vm154_vm2, %v1262_v15, %v1249_v12 }
 0xc3e   :  { %v1051_v7 = vpack.c.bf16 %v1050_v54, %v1049_v53 }
 0xc40   :  { %1449 = vmatmul.mubr.msk.bf16.vlgmr.msra.gmra.mrb[12].mxu0 %vm415_vm3, %v1051_v7 }
 0xc41   :  { %1468 = vmatprep.mubr.msk.bf16.mxu0 %vm1659_vm0, %v1658_v0  ;;  %1453 = vmatpush3.bf16.msra.mxu0 %v1534_v13 }
 0xc42   :  { %1454 = vmatprep.subr.bf16.mxu0 %v1658_v0 }
 0xc45   :  { %1455 = vmatpush3.bf16.msra.mxu0 %v1535_v10 }
 0xc46   :  { %1456 = vmatprep.subr.bf16.mxu0 %v1658_v0 }
 0xc49   :  { %1457 = vmatpush3.bf16.msra.mxu0 %v1536_v14 }
 0xc4a   :  { %1458 = vmatprep.subr.bf16.mxu0 %v1658_v0 }
 0xc4d   :  { %1459 = vmatpush3.bf16.msra.mxu0 %v1537_v19 }
 0xc4e   :  { %1460 = vmatprep.subr.bf16.mxu0 %v1658_v0 }
 0xc51   :  { %1461 = vmatpush3.bf16.msra.mxu0 %v1538_v1 }
 0xc52   :  { %1462 = vmatprep.subr.bf16.mxu0 %v1658_v0 }
 0xc55   :  { %1463 = vmatpush3.bf16.msra.mxu0 %v1539_v8 }
 0xc56   :  { %1464 = vmatprep.subr.bf16.mxu0 %v1658_v0 }
 0xc59   :  { %1465 = vmatpush3.bf16.msra.mxu0 %v1540_v2 }
 0xc5a   :  { %1466 = vmatprep.subr.bf16.mxu0 %v1658_v0  ;;  %v1510_v0 = vpop.permute.xlu1 %1509 }
 0xc5b   :  { %v1512_v27 = vunpack.i.h.bf16 %v1510_v0  ;;  %v1511_v11 = vunpack.i.l.bf16 %v1510_v0 }
 0xc5d   :  { %1467 = vmatpush3.bf16.msra.mxu0 %v1541_v20  ;;  %v1125_v32 = vsel %vm106_vm1, %v1123_v51, %v1511_v11  ;;  %v1126_v33 = vsel %vm106_vm1, %v1124_v6, %v1512_v27 }
 0xcac   :  { %v1257_v17 = vpop.permute.xlu0 %1256 }
 0xcad   :  { %v1267_v18 = vsel %vm1266_vm4, %v1264_v16, %v1257_v17 }
 0xcae   :  { %1269 = vst.msk [vmem:[%s2108_s11] sm:$0xff] %vm106_vm1, %v1267_v18 }
 0xd13   :  { %v1092_v21 = vpop.f32.mrb[12].mxu0 }
 0xd14   :  { %v1450_v22 = vpop.f32.mrb[13].mxu0 }
 0xd15   :  { %v1095_v23 = vpop.f32.mrb[14].mxu0 }
 0xd16   :  { %v1513_v25 = vpack.i.bf16 %v1095_v23, %v1092_v21  ;;  %v1451_v37 = vpop.f32.mrb[15].mxu0 }
 0xd18   :  { %1514 = vrot.lane.b32.xlu1 %v1513_v25, %s1660_s4 }
 0xd1c   :  { %1242 = vrot.lane.b32.xlu1 %v1949_v45, %s1666_s3 }
 0xd20   :  { %1250 = vrot.lane.b32.xlu1 %v1987_v24, %s1662_s2  ;;  %s1668_s2 = smov [#allocation7]  }
 0xd21   :  { %s1276_s0 = sshll.u32 %s1668_s2, 4  ;;  %s1277_s0 = int_to_ptr.vmem [resolvable:$true] %s1276_s0 }
 0xd22   :  { %s1626_s17 = scalar_lea.vmem %s1277_s0, 256  ;;  %p1631_p3 = scmp.lt.s32.totalorder %s1277_s0, %s1277_s0 }
 0xd23   :  { %p1627_p2 = scmp.ne.s32.totalorder %s1277_s0, %s1626_s17  ;;  %p1632_p4 = scmp.lt.s32.totalorder %s1626_s17, %s1626_s17 }
 0xd24   :  { %1258 = vrot.lane.b32.xlu1 %v1050_v54, %s1667_s21 }
 0xd25   :  { %p1633_p5 = por %p1632_p4, %p1631_p3 }
 0xd27   :  { %p1634_p6 = pnand %p1633_p5, %p1627_p2 }
 0xd8a   :  { %v1515_v29 = vpop.permute.xlu1 %1514 }
 0xd8b   :  { %v1517_v31 = vunpack.i.h.bf16 %v1515_v29  ;;  %v1516_v30 = vunpack.i.l.bf16 %v1515_v29 }
 0xd8d   :  { %v1129_v34 = vsel %vm1127_vm5, %v1126_v33, %v1517_v31  ;;  %v1128_v35 = vsel %vm1127_vm5, %v1125_v32, %v1516_v30 }
 0xd8e   :  { %v1146_v36 = vpack.c.bf16 %v1129_v34, %v1128_v35  ;;  %v1243_v45 = vpop.permute.xlu1 %1242 }
 0xd8f   :  { %v1263_v24 = vsel %vm415_vm3, %v1911_v3, %v1243_v45 }
 0xd90   :  { %1469 = vmatmul.mubr.bf16.vlgmr.msra.gmra.mrb[16].mxu0 %v1146_v36 }
 0xd92   :  { %v1251_v38 = vpop.permute.xlu1 %1250 }
 0xd93   :  { %v1265_v26 = vsel %vm154_vm2, %v1263_v24, %v1251_v38 }
 0xd96   :  { %v1259_v40 = vpop.permute.xlu1 %1258 }
 0xd97   :  { %v1268_v41 = vsel %vm1266_vm4, %v1265_v26, %v1259_v40 }
 0xd98   :  { %1270 = vst.msk [vmem:[%s2108_s11 + $0x8] sm:$0xff] %vm106_vm1, %v1268_v41 }
 0xe63   :  { %v1229_v42 = vpop.f32.mrb[16].mxu0 }
 0xe64   :  { %1236 = vst.msk [vmem:[#allocation7] sm:$0xff] %vm106_vm1, %v1229_v42  ;;  %v1470_v46 = vpop.f32.mrb[17].mxu0 }
 0xe65   :  { %v1232_v47 = vpop.f32.mrb[18].mxu0 }
 0xe66   :  { %1237 = vst.msk [vmem:[#allocation7 + $0x8] sm:$0xff] %vm106_vm1, %v1232_v47  ;;  %v1471_v3 = vpop.f32.mrb[19].mxu0 }
 0xe67   :  { %1637 = shalt.err (!%p1634_p6)
}
 0xe68   :  { %s1638_s20 = scalar_lea.hbm %s2107_s10, 256 }
 0xe69   :  { %p1639_p7 = scmp.ne.s32.totalorder %s2107_s10, %s1638_s20  ;;  %p1642_p8 = scmp.lt.u32.totalorder %s1638_s20, %s2107_s10 }
 0xe6b   :  { %p1644_p9 = pnand %p1642_p8, %p1639_p7 }
 0xe6d   :  { %1647 = shalt.err (!%p1644_p9)
}
 0xe6e   :  { %1282 = dma.vmem_to_hbm [thread:$0]  %s1277_s0, 256, %s2107_s10, [#allocation4], %s1655_s27, %s1655_s27, %s1656_s28  }
 0xe6f   :  { %1652 = dma.done.wait [#allocation4], 256  }
 0xe70   :  { %1653 = vsyncadd [#allocation4], 4294967040 }
 0xe71   :  { %1290 = vsyncpa [#allocation3], 1 }
 0xe72   :  { %1291 = vsyncpa [#allocation6], 1 }
 0xe73   :  { %1292 = vsyncpa [#allocation4], 1 }

</bundles_post_ra>
